<compile_context>
chip_gen: v7x
topology: tpu7x:2x2x1
jax: 0.10.0
libtpu: 0.0.40
codegen_flags: <defaults>
</compile_context>

<pallas_src>
import functools

import jax
import jax.numpy as jnp
from jax import lax
from jax.experimental import pallas as pl
from jax.experimental.pallas import tpu as pltpu


def _ceil_to(n, m):
    return ((n + m - 1) // m) * m


# ----------------------------------------------------------------------------
# Fused forward kernel.
# PyTorch gate order: i, f, g, o.  gates = x @ W_ih^T + h @ W_hh^T + (b_ih + b_hh)
# All weights live in a single pre-packed (rows, lane) f32 slab; offsets are static.
# x_ref is the time-major input flattened to (T*Bp, D0).
# ----------------------------------------------------------------------------
def _fused_forward_kernel(x_ref, w_ref, out_ref, seq_scr, *, meta, activation,
                          seq_len, bp):
    lstm_meta, dense_meta, out_meta = meta
    T, Bp = seq_len, bp
    num_lstm = len(lstm_meta)

    # Whole layer-0 input is resident in VMEM.
    x_all = x_ref[...]                                        # (T*Bp, D0)

    feat = None
    for li, (Din, H, wih_off, whh_off, b_off) in enumerate(lstm_meta):
        wih = w_ref[wih_off:wih_off + Din, 0:4 * H]           # (Din, 4H)
        whh = w_ref[whh_off:whh_off + H, 0:4 * H]             # (H,   4H)
        b = w_ref[b_off:b_off + 1, 0:4 * H]                   # (1,   4H)

        # Hoisted input projection: one matmul for ALL timesteps (off the serial chain).
        gx = jnp.dot(x_all, wih, preferred_element_type=jnp.float32) + b   # (T*Bp, 4H)

        h = jnp.zeros((Bp, H), jnp.float32)
        c = jnp.zeros((Bp, H), jnp.float32)
        last = (li == num_lstm - 1)
        for t in range(T):                                    # fully unrolled (T=8)
            gates = gx[t * Bp:(t + 1) * Bp, :] + jnp.dot(
                h, whh, preferred_element_type=jnp.float32)   # (Bp, 4H)
            # Full-vreg EUP passes, then cheap lane slices (XLU).
            sg = jax.nn.sigmoid(gates)
            th = jnp.tanh(gates)
            i_g = sg[:, 0 * H:1 * H]
            f_g = sg[:, 1 * H:2 * H]
            o_g = sg[:, 3 * H:4 * H]
            g_g = th[:, 2 * H:3 * H]
            c = f_g * c + i_g * g_g
            h = o_g * jnp.tanh(c)
            if not last:
                # Sublane-contiguous store; intermediate sequence never touches HBM.
                seq_scr[t * Bp:(t + 1) * Bp, 0:H] = h
        if not last:
            x_all = seq_scr[0:T * Bp, 0:H]                    # feeds next layer's projection
        else:
            feat = h                                          # only final hidden state needed

    # Dense stack with activation (weights sliced from the resident slab).
    for (Din, N, w_off, b_off) in dense_meta:
        w = w_ref[w_off:w_off + Din, 0:N]
        b = w_ref[b_off:b_off + 1, 0:N]
        feat = jnp.dot(feat, w, preferred_element_type=jnp.float32) + b
        if activation == "sigmoid":
            feat = jax.nn.sigmoid(feat)
        else:
            feat = jnp.maximum(feat, 0.0)

    # Output linear; padded to a full 128-lane slab -> single unmasked store.
    Din, OUT, OUTP, wo_off, bo_off = out_meta
    wo = w_ref[wo_off:wo_off + Din, 0:OUTP]
    bo = w_ref[bo_off:bo_off + 1, 0:OUTP]
    y = jnp.dot(feat, wo, preferred_element_type=jnp.float32) + bo
    out_ref[...] = y.astype(out_ref.dtype)


# ----------------------------------------------------------------------------
# One-time parameter packing: all weights -> single f32 (rows, lane) slab + static meta.
# Every segment is 8-row aligned (sublane tile) and lane-padded; gate weights are
# pre-transposed and the two LSTM biases pre-summed.
# ----------------------------------------------------------------------------
def prepack_params(params):
    widths = [4 * w_hh.shape[1] for (_, w_hh, _, _) in params["lstm"]]
    widths += [w.shape[0] for (w, _) in params["dense"]]
    w_out, b_out = params["out"]
    OUT = w_out.shape[0]
    OUTP = _ceil_to(OUT, 128)
    widths.append(OUTP)
    lane = _ceil_to(max(widths), 128)

    segments = []
    off = 0

    def add(arr2d):
        nonlocal off
        arr2d = jnp.asarray(arr2d, jnp.float32)
        r, c = arr2d.shape
        rp = _ceil_to(r, 8)
        seg = jnp.zeros((rp, lane), jnp.float32).at[:r, :c].set(arr2d)
        segments.append(seg)
        start = off
        off += rp
        return start

    lstm_meta = []
    for (w_ih, w_hh, b_ih, b_hh) in params["lstm"]:
        H = w_hh.shape[1]
        Din = w_ih.shape[1]
        wih_off = add(w_ih.T)                               # (Din, 4H)
        whh_off = add(w_hh.T)                               # (H, 4H)
        b_off = add((b_ih + b_hh)[None, :])                 # (1, 4H)
        lstm_meta.append((Din, H, wih_off, whh_off, b_off))

    dense_meta = []
    for (w, b) in params["dense"]:
        N, Din = w.shape
        w_off = add(w.T)                                    # (Din, N)
        b_off = add(b[None, :])
        dense_meta.append((Din, N, w_off, b_off))

    Din = w_out.shape[1]
    wo_off = add(w_out.T)                                   # (Din, OUT) -> lane-padded
    bo_off = add(b_out[None, :])
    out_meta = (Din, OUT, OUTP, wo_off, bo_off)

    slab = jnp.concatenate(segments, axis=0)
    meta = (tuple(lstm_meta), tuple(dense_meta), out_meta)
    return slab, meta


# ----------------------------------------------------------------------------
# Jitted wrapper: one dispatch per call, two kernel inputs (x, weight slab).
# ----------------------------------------------------------------------------
@functools.partial(jax.jit, static_argnames=("meta", "activation"))
def lstm_predictor_forward(slab, x_btd, *, meta, activation="relu"):
    B, T, D = x_btd.shape
    Bp = _ceil_to(B, 8)                                     # pad batch to f32 sublane tile

    x_tm = jnp.swapaxes(x_btd, 0, 1)                        # (T, B, D) time-major
    if Bp != B:
        x_tm = jnp.pad(x_tm, ((0, 0), (0, Bp - B), (0, 0)))
    x_flat = x_tm.reshape(T * Bp, D)                        # rows t*Bp..t*Bp+Bp = timestep t

    lstm_meta, _, out_meta = meta
    OUT, OUTP = out_meta[1], out_meta[2]
    Hs = max(m[1] for m in lstm_meta)

    kernel = functools.partial(_fused_forward_kernel, meta=meta,
                               activation=activation, seq_len=T, bp=Bp)
    out = pl.pallas_call(
        kernel,
        out_shape=jax.ShapeDtypeStruct((Bp, OUTP), jnp.float32),
        in_specs=[pl.BlockSpec(memory_space=pltpu.MemorySpace.VMEM),
                  pl.BlockSpec(memory_space=pltpu.MemorySpace.VMEM)],
        out_specs=pl.BlockSpec(memory_space=pltpu.MemorySpace.VMEM),
        scratch_shapes=[pltpu.VMEM((T * Bp, Hs), jnp.float32)],
    )(x_flat, slab)
    return out[:B, :OUT]


# ----------------------------------------------------------------------------
# Parameter init (deterministic, PyTorch-like uniform(-1/sqrt(H), 1/sqrt(H)))
# ----------------------------------------------------------------------------
def init_params(key, input_size, lstm_neurons, dense_neurons, output_size):
    params = {"lstm": [], "dense": [], "out": None}
    for i, H in enumerate(lstm_neurons):
        D = input_size if i == 0 else lstm_neurons[i - 1]
        k = 1.0 / jnp.sqrt(H)
        key, k1, k2, k3, k4 = jax.random.split(key, 5)
        w_ih = jax.random.uniform(k1, (4 * H, D), jnp.float32, -k, k)
        w_hh = jax.random.uniform(k2, (4 * H, H), jnp.float32, -k, k)
        b_ih = jax.random.uniform(k3, (4 * H,), jnp.float32, -k, k)
        b_hh = jax.random.uniform(k4, (4 * H,), jnp.float32, -k, k)
        params["lstm"].append((w_ih, w_hh, b_ih, b_hh))
    for i, N in enumerate(dense_neurons):
        D = lstm_neurons[-1] if i == 0 else dense_neurons[i - 1]
        k = 1.0 / jnp.sqrt(D)
        key, k1, k2 = jax.random.split(key, 3)
        w = jax.random.uniform(k1, (N, D), jnp.float32, -k, k)
        b = jax.random.uniform(k2, (N,), jnp.float32, -k, k)
        params["dense"].append((w, b))
    D = dense_neurons[-1]
    k = 1.0 / jnp.sqrt(D)
    key, k1, k2 = jax.random.split(key, 3)
    params["out"] = (jax.random.uniform(k1, (output_size, D), jnp.float32, -k, k),
                     jax.random.uniform(k2, (output_size,), jnp.float32, -k, k))
    return params


# ----------------------------------------------------------------------------
# Pure-JAX reference (for correctness check)
# ----------------------------------------------------------------------------
def _lstm_ref(x_btd, w_ih, w_hh, b_ih, b_hh):
    B, T, D = x_btd.shape
    H = w_hh.shape[1]

    def step(carry, x_t):
        h, c = carry
        gates = x_t @ w_ih.T + b_ih + h @ w_hh.T + b_hh
        i, f, g, o = jnp.split(gates, 4, axis=-1)
        i, f, o = jax.nn.sigmoid(i), jax.nn.sigmoid(f), jax.nn.sigmoid(o)
        g = jnp.tanh(g)
        c = f * c + i * g
        h = o * jnp.tanh(c)
        return (h, c), h

    h0 = jnp.zeros((B, H), jnp.float32)
    c0 = jnp.zeros((B, H), jnp.float32)
    _, hs = lax.scan(step, (h0, c0), jnp.swapaxes(x_btd, 0, 1))
    return jnp.swapaxes(hs, 0, 1)


def forward_ref(params, x_btd, activation="relu"):
    h = x_btd
    for (w_ih, w_hh, b_ih, b_hh) in params["lstm"]:
        h = _lstm_ref(h, w_ih, w_hh, b_ih, b_hh)
    x = h[:, -1, :]
    act = jax.nn.sigmoid if activation == "sigmoid" else jax.nn.relu
    for (w, b) in params["dense"]:
        x = act(x @ w.T + b)
    w, b = params["out"]
    return x @ w.T + b


if __name__ == "__main__":
    # Small shapes consistent with the module: batch=2, seq=8, input_size=4,
    # lstm_neurons=[32, 32], dense_neurons=[16], output_size=1, activation='relu'.
    B, T, INPUT_SIZE = 2, 8, 4
    LSTM_NEURONS = [32, 32]
    DENSE_NEURONS = [16]
    OUTPUT_SIZE = 1
    ACT = "relu"

    key = jax.random.PRNGKey(0)
    pkey, xkey = jax.random.split(key)
    params = init_params(pkey, INPUT_SIZE, LSTM_NEURONS, DENSE_NEURONS, OUTPUT_SIZE)
    x = jax.random.normal(xkey, (B, T, INPUT_SIZE), jnp.float32)

    # One-time packing (outside the per-call path).
    slab, meta = prepack_params(params)
    slab = jax.block_until_ready(slab)

    out = lstm_predictor_forward(slab, x, meta=meta, activation=ACT)
    out = jax.block_until_ready(out)

    ref = jax.block_until_ready(forward_ref(params, x, activation=ACT))
    assert out.shape == (B, OUTPUT_SIZE), out.shape
    assert jnp.allclose(out, ref, atol=1e-4, rtol=1e-4), (out, ref)

    print("KERNEL_OK")
</pallas_src>

<mosaic_0001>
module attributes {stable_mosaic.version = 11 : i64} {
  func.func @_fused_forward_kernel(%arg0: memref<64x4xf32, #tpu.memory_space<vmem>>, %arg1: memref<184x128xf32, #tpu.memory_space<vmem>>, %arg2: memref<8x128xf32, #tpu.memory_space<vmem>>, %arg3: memref<64x32xf32, #tpu.memory_space<vmem>>) attributes {dimension_semantics = [], scalar_prefetch = 0 : i64, scratch_operands = 1 : i64, tpu.core_type = #tpu.core_type<tc>} {
    %c0 = arith.constant 0 : index
    %c0_0 = arith.constant 0 : index
    %0 = vector.load %arg0[%c0, %c0_0] : memref<64x4xf32, #tpu.memory_space<vmem>>, vector<64x4xf32>
    %c0_1 = arith.constant 0 : index
    %c0_2 = arith.constant 0 : index
    %1 = vector.load %arg1[%c0_1, %c0_2] : memref<184x128xf32, #tpu.memory_space<vmem>>, vector<4x128xf32>
    %c8 = arith.constant 8 : index
    %c0_3 = arith.constant 0 : index
    %2 = vector.load %arg1[%c8, %c0_3] : memref<184x128xf32, #tpu.memory_space<vmem>>, vector<32x128xf32>
    %c40 = arith.constant 40 : index
    %c0_4 = arith.constant 0 : index
    %3 = vector.load %arg1[%c40, %c0_4] : memref<184x128xf32, #tpu.memory_space<vmem>>, vector<1x128xf32>
    %cst = arith.constant dense<0.000000e+00> : vector<64x128xf32>
    %4 = tpu.matmul %0, %1, %cst {dimension_numbers = #tpu.dot_dimension_numbers<[1], [0], [0], [1], [0, 0, 1, 1], [], []>} : vector<64x4xf32>, vector<4x128xf32>, vector<64x128xf32> -> vector<64x128xf32>
    %5 = vector.broadcast %3 : vector<1x128xf32> to vector<64x128xf32>
    %6 = arith.addf %4, %5 : vector<64x128xf32>
    %cst_5 = arith.constant 0.000000e+00 : f32
    %7 = vector.broadcast %cst_5 : f32 to vector<8x32xf32>
    %cst_6 = arith.constant 0.000000e+00 : f32
    %8 = vector.broadcast %cst_6 : f32 to vector<8x32xf32>
    %9 = vector.extract_strided_slice %6 {offsets = [0, 0], sizes = [8, 128], strides = [1, 1]} : vector<64x128xf32> to vector<8x128xf32>
    %cst_7 = arith.constant dense<0.000000e+00> : vector<8x128xf32>
    %10 = tpu.matmul %7, %2, %cst_7 {dimension_numbers = #tpu.dot_dimension_numbers<[1], [0], [0], [1], [0, 0, 1, 1], [], []>} : vector<8x32xf32>, vector<32x128xf32>, vector<8x128xf32> -> vector<8x128xf32>
    %11 = arith.addf %9, %10 : vector<8x128xf32>
    %12 = arith.negf %11 : vector<8x128xf32>
    %13 = math.exp %12 : vector<8x128xf32>
    %cst_8 = arith.constant 1.000000e+00 : f32
    %14 = vector.broadcast %cst_8 : f32 to vector<8x128xf32>
    %15 = arith.addf %14, %13 : vector<8x128xf32>
    %16 = arith.divf %14, %15 : vector<8x128xf32>
    %17 = math.tanh %11 : vector<8x128xf32>
    %18 = vector.extract_strided_slice %16 {offsets = [0, 0], sizes = [8, 32], strides = [1, 1]} : vector<8x128xf32> to vector<8x32xf32>
    %19 = vector.extract_strided_slice %16 {offsets = [0, 32], sizes = [8, 32], strides = [1, 1]} : vector<8x128xf32> to vector<8x32xf32>
    %20 = vector.extract_strided_slice %16 {offsets = [0, 96], sizes = [8, 32], strides = [1, 1]} : vector<8x128xf32> to vector<8x32xf32>
    %21 = vector.extract_strided_slice %17 {offsets = [0, 64], sizes = [8, 32], strides = [1, 1]} : vector<8x128xf32> to vector<8x32xf32>
    %22 = arith.mulf %19, %8 : vector<8x32xf32>
    %23 = arith.mulf %18, %21 : vector<8x32xf32>
    %24 = arith.addf %22, %23 : vector<8x32xf32>
    %25 = math.tanh %24 : vector<8x32xf32>
    %26 = arith.mulf %20, %25 : vector<8x32xf32>
    %c0_9 = arith.constant 0 : index
    %c0_10 = arith.constant 0 : index
    %27 = vector.load %arg3[%c0_9, %c0_10] : memref<64x32xf32, #tpu.memory_space<vmem>>, vector<8x32xf32>
    tpu.vector_store %arg3[%c0_9, %c0_10], %26 {strides = array<i32>} : memref<64x32xf32, #tpu.memory_space<vmem>>, vector<8x32xf32>,
    %28 = vector.extract_strided_slice %6 {offsets = [8, 0], sizes = [8, 128], strides = [1, 1]} : vector<64x128xf32> to vector<8x128xf32>
    %cst_11 = arith.constant dense<0.000000e+00> : vector<8x128xf32>
    %29 = tpu.matmul %26, %2, %cst_11 {dimension_numbers = #tpu.dot_dimension_numbers<[1], [0], [0], [1], [0, 0, 1, 1], [], []>} : vector<8x32xf32>, vector<32x128xf32>, vector<8x128xf32> -> vector<8x128xf32>
    %30 = arith.addf %28, %29 : vector<8x128xf32>
    %31 = arith.negf %30 : vector<8x128xf32>
    %32 = math.exp %31 : vector<8x128xf32>
    %cst_12 = arith.constant 1.000000e+00 : f32
    %33 = vector.broadcast %cst_12 : f32 to vector<8x128xf32>
    %34 = arith.addf %33, %32 : vector<8x128xf32>
    %35 = arith.divf %33, %34 : vector<8x128xf32>
    %36 = math.tanh %30 : vector<8x128xf32>
    %37 = vector.extract_strided_slice %35 {offsets = [0, 0], sizes = [8, 32], strides = [1, 1]} : vector<8x128xf32> to vector<8x32xf32>
    %38 = vector.extract_strided_slice %35 {offsets = [0, 32], sizes = [8, 32], strides = [1, 1]} : vector<8x128xf32> to vector<8x32xf32>
    %39 = vector.extract_strided_slice %35 {offsets = [0, 96], sizes = [8, 32], strides = [1, 1]} : vector<8x128xf32> to vector<8x32xf32>
    %40 = vector.extract_strided_slice %36 {offsets = [0, 64], sizes = [8, 32], strides = [1, 1]} : vector<8x128xf32> to vector<8x32xf32>
    %41 = arith.mulf %38, %24 : vector<8x32xf32>
    %42 = arith.mulf %37, %40 : vector<8x32xf32>
    %43 = arith.addf %41, %42 : vector<8x32xf32>
    %44 = math.tanh %43 : vector<8x32xf32>
    %45 = arith.mulf %39, %44 : vector<8x32xf32>
    %c8_13 = arith.constant 8 : index
    %c0_14 = arith.constant 0 : index
    %46 = vector.load %arg3[%c8_13, %c0_14] : memref<64x32xf32, #tpu.memory_space<vmem>>, vector<8x32xf32>
    tpu.vector_store %arg3[%c8_13, %c0_14], %45 {strides = array<i32>} : memref<64x32xf32, #tpu.memory_space<vmem>>, vector<8x32xf32>,
    %47 = vector.extract_strided_slice %6 {offsets = [16, 0], sizes = [8, 128], strides = [1, 1]} : vector<64x128xf32> to vector<8x128xf32>
    %cst_15 = arith.constant dense<0.000000e+00> : vector<8x128xf32>
    %48 = tpu.matmul %45, %2, %cst_15 {dimension_numbers = #tpu.dot_dimension_numbers<[1], [0], [0], [1], [0, 0, 1, 1], [], []>} : vector<8x32xf32>, vector<32x128xf32>, vector<8x128xf32> -> vector<8x128xf32>
    %49 = arith.addf %47, %48 : vector<8x128xf32>
    %50 = arith.negf %49 : vector<8x128xf32>
    %51 = math.exp %50 : vector<8x128xf32>
    %cst_16 = arith.constant 1.000000e+00 : f32
    %52 = vector.broadcast %cst_16 : f32 to vector<8x128xf32>
    %53 = arith.addf %52, %51 : vector<8x128xf32>
    %54 = arith.divf %52, %53 : vector<8x128xf32>
    %55 = math.tanh %49 : vector<8x128xf32>
    %56 = vector.extract_strided_slice %54 {offsets = [0, 0], sizes = [8, 32], strides = [1, 1]} : vector<8x128xf32> to vector<8x32xf32>
    %57 = vector.extract_strided_slice %54 {offsets = [0, 32], sizes = [8, 32], strides = [1, 1]} : vector<8x128xf32> to vector<8x32xf32>
    %58 = vector.extract_strided_slice %54 {offsets = [0, 96], sizes = [8, 32], strides = [1, 1]} : vector<8x128xf32> to vector<8x32xf32>
    %59 = vector.extract_strided_slice %55 {offsets = [0, 64], sizes = [8, 32], strides = [1, 1]} : vector<8x128xf32> to vector<8x32xf32>
    %60 = arith.mulf %57, %43 : vector<8x32xf32>
    %61 = arith.mulf %56, %59 : vector<8x32xf32>
    %62 = arith.addf %60, %61 : vector<8x32xf32>
    %63 = math.tanh %62 : vector<8x32xf32>
    %64 = arith.mulf %58, %63 : vector<8x32xf32>
    %c16 = arith.constant 16 : index
    %c0_17 = arith.constant 0 : index
    %65 = vector.load %arg3[%c16, %c0_17] : memref<64x32xf32, #tpu.memory_space<vmem>>, vector<8x32xf32>
    tpu.vector_store %arg3[%c16, %c0_17], %64 {strides = array<i32>} : memref<64x32xf32, #tpu.memory_space<vmem>>, vector<8x32xf32>,
    %66 = vector.extract_strided_slice %6 {offsets = [24, 0], sizes = [8, 128], strides = [1, 1]} : vector<64x128xf32> to vector<8x128xf32>
    %cst_18 = arith.constant dense<0.000000e+00> : vector<8x128xf32>
    %67 = tpu.matmul %64, %2, %cst_18 {dimension_numbers = #tpu.dot_dimension_numbers<[1], [0], [0], [1], [0, 0, 1, 1], [], []>} : vector<8x32xf32>, vector<32x128xf32>, vector<8x128xf32> -> vector<8x128xf32>
    %68 = arith.addf %66, %67 : vector<8x128xf32>
    %69 = arith.negf %68 : vector<8x128xf32>
    %70 = math.exp %69 : vector<8x128xf32>
    %cst_19 = arith.constant 1.000000e+00 : f32
    %71 = vector.broadcast %cst_19 : f32 to vector<8x128xf32>
    %72 = arith.addf %71, %70 : vector<8x128xf32>
    %73 = arith.divf %71, %72 : vector<8x128xf32>
    %74 = math.tanh %68 : vector<8x128xf32>
    %75 = vector.extract_strided_slice %73 {offsets = [0, 0], sizes = [8, 32], strides = [1, 1]} : vector<8x128xf32> to vector<8x32xf32>
    %76 = vector.extract_strided_slice %73 {offsets = [0, 32], sizes = [8, 32], strides = [1, 1]} : vector<8x128xf32> to vector<8x32xf32>
    %77 = vector.extract_strided_slice %73 {offsets = [0, 96], sizes = [8, 32], strides = [1, 1]} : vector<8x128xf32> to vector<8x32xf32>
    %78 = vector.extract_strided_slice %74 {offsets = [0, 64], sizes = [8, 32], strides = [1, 1]} : vector<8x128xf32> to vector<8x32xf32>
    %79 = arith.mulf %76, %62 : vector<8x32xf32>
    %80 = arith.mulf %75, %78 : vector<8x32xf32>
    %81 = arith.addf %79, %80 : vector<8x32xf32>
    %82 = math.tanh %81 : vector<8x32xf32>
    %83 = arith.mulf %77, %82 : vector<8x32xf32>
    %c24 = arith.constant 24 : index
    %c0_20 = arith.constant 0 : index
    %84 = vector.load %arg3[%c24, %c0_20] : memref<64x32xf32, #tpu.memory_space<vmem>>, vector<8x32xf32>
    tpu.vector_store %arg3[%c24, %c0_20], %83 {strides = array<i32>} : memref<64x32xf32, #tpu.memory_space<vmem>>, vector<8x32xf32>,
    %85 = vector.extract_strided_slice %6 {offsets = [32, 0], sizes = [8, 128], strides = [1, 1]} : vector<64x128xf32> to vector<8x128xf32>
    %cst_21 = arith.constant dense<0.000000e+00> : vector<8x128xf32>
    %86 = tpu.matmul %83, %2, %cst_21 {dimension_numbers = #tpu.dot_dimension_numbers<[1], [0], [0], [1], [0, 0, 1, 1], [], []>} : vector<8x32xf32>, vector<32x128xf32>, vector<8x128xf32> -> vector<8x128xf32>
    %87 = arith.addf %85, %86 : vector<8x128xf32>
    %88 = arith.negf %87 : vector<8x128xf32>
    %89 = math.exp %88 : vector<8x128xf32>
    %cst_22 = arith.constant 1.000000e+00 : f32
    %90 = vector.broadcast %cst_22 : f32 to vector<8x128xf32>
    %91 = arith.addf %90, %89 : vector<8x128xf32>
    %92 = arith.divf %90, %91 : vector<8x128xf32>
    %93 = math.tanh %87 : vector<8x128xf32>
    %94 = vector.extract_strided_slice %92 {offsets = [0, 0], sizes = [8, 32], strides = [1, 1]} : vector<8x128xf32> to vector<8x32xf32>
    %95 = vector.extract_strided_slice %92 {offsets = [0, 32], sizes = [8, 32], strides = [1, 1]} : vector<8x128xf32> to vector<8x32xf32>
    %96 = vector.extract_strided_slice %92 {offsets = [0, 96], sizes = [8, 32], strides = [1, 1]} : vector<8x128xf32> to vector<8x32xf32>
    %97 = vector.extract_strided_slice %93 {offsets = [0, 64], sizes = [8, 32], strides = [1, 1]} : vector<8x128xf32> to vector<8x32xf32>
    %98 = arith.mulf %95, %81 : vector<8x32xf32>
    %99 = arith.mulf %94, %97 : vector<8x32xf32>
    %100 = arith.addf %98, %99 : vector<8x32xf32>
    %101 = math.tanh %100 : vector<8x32xf32>
    %102 = arith.mulf %96, %101 : vector<8x32xf32>
    %c32 = arith.constant 32 : index
    %c0_23 = arith.constant 0 : index
    %103 = vector.load %arg3[%c32, %c0_23] : memref<64x32xf32, #tpu.memory_space<vmem>>, vector<8x32xf32>
    tpu.vector_store %arg3[%c32, %c0_23], %102 {strides = array<i32>} : memref<64x32xf32, #tpu.memory_space<vmem>>, vector<8x32xf32>,
    %104 = vector.extract_strided_slice %6 {offsets = [40, 0], sizes = [8, 128], strides = [1, 1]} : vector<64x128xf32> to vector<8x128xf32>
    %cst_24 = arith.constant dense<0.000000e+00> : vector<8x128xf32>
    %105 = tpu.matmul %102, %2, %cst_24 {dimension_numbers = #tpu.dot_dimension_numbers<[1], [0], [0], [1], [0, 0, 1, 1], [], []>} : vector<8x32xf32>, vector<32x128xf32>, vector<8x128xf32> -> vector<8x128xf32>
    %106 = arith.addf %104, %105 : vector<8x128xf32>
    %107 = arith.negf %106 : vector<8x128xf32>
    %108 = math.exp %107 : vector<8x128xf32>
    %cst_25 = arith.constant 1.000000e+00 : f32
    %109 = vector.broadcast %cst_25 : f32 to vector<8x128xf32>
    %110 = arith.addf %109, %108 : vector<8x128xf32>
    %111 = arith.divf %109, %110 : vector<8x128xf32>
    %112 = math.tanh %106 : vector<8x128xf32>
    %113 = vector.extract_strided_slice %111 {offsets = [0, 0], sizes = [8, 32], strides = [1, 1]} : vector<8x128xf32> to vector<8x32xf32>
    %114 = vector.extract_strided_slice %111 {offsets = [0, 32], sizes = [8, 32], strides = [1, 1]} : vector<8x128xf32> to vector<8x32xf32>
    %115 = vector.extract_strided_slice %111 {offsets = [0, 96], sizes = [8, 32], strides = [1, 1]} : vector<8x128xf32> to vector<8x32xf32>
    %116 = vector.extract_strided_slice %112 {offsets = [0, 64], sizes = [8, 32], strides = [1, 1]} : vector<8x128xf32> to vector<8x32xf32>
    %117 = arith.mulf %114, %100 : vector<8x32xf32>
    %118 = arith.mulf %113, %116 : vector<8x32xf32>
    %119 = arith.addf %117, %118 : vector<8x32xf32>
    %120 = math.tanh %119 : vector<8x32xf32>
    %121 = arith.mulf %115, %120 : vector<8x32xf32>
    %c40_26 = arith.constant 40 : index
    %c0_27 = arith.constant 0 : index
    %122 = vector.load %arg3[%c40_26, %c0_27] : memref<64x32xf32, #tpu.memory_space<vmem>>, vector<8x32xf32>
    tpu.vector_store %arg3[%c40_26, %c0_27], %121 {strides = array<i32>} : memref<64x32xf32, #tpu.memory_space<vmem>>, vector<8x32xf32>,
    %123 = vector.extract_strided_slice %6 {offsets = [48, 0], sizes = [8, 128], strides = [1, 1]} : vector<64x128xf32> to vector<8x128xf32>
    %cst_28 = arith.constant dense<0.000000e+00> : vector<8x128xf32>
    %124 = tpu.matmul %121, %2, %cst_28 {dimension_numbers = #tpu.dot_dimension_numbers<[1], [0], [0], [1], [0, 0, 1, 1], [], []>} : vector<8x32xf32>, vector<32x128xf32>, vector<8x128xf32> -> vector<8x128xf32>
    %125 = arith.addf %123, %124 : vector<8x128xf32>
    %126 = arith.negf %125 : vector<8x128xf32>
    %127 = math.exp %126 : vector<8x128xf32>
    %cst_29 = arith.constant 1.000000e+00 : f32
    %128 = vector.broadcast %cst_29 : f32 to vector<8x128xf32>
    %129 = arith.addf %128, %127 : vector<8x128xf32>
    %130 = arith.divf %128, %129 : vector<8x128xf32>
    %131 = math.tanh %125 : vector<8x128xf32>
    %132 = vector.extract_strided_slice %130 {offsets = [0, 0], sizes = [8, 32], strides = [1, 1]} : vector<8x128xf32> to vector<8x32xf32>
    %133 = vector.extract_strided_slice %130 {offsets = [0, 32], sizes = [8, 32], strides = [1, 1]} : vector<8x128xf32> to vector<8x32xf32>
    %134 = vector.extract_strided_slice %130 {offsets = [0, 96], sizes = [8, 32], strides = [1, 1]} : vector<8x128xf32> to vector<8x32xf32>
    %135 = vector.extract_strided_slice %131 {offsets = [0, 64], sizes = [8, 32], strides = [1, 1]} : vector<8x128xf32> to vector<8x32xf32>
    %136 = arith.mulf %133, %119 : vector<8x32xf32>
    %137 = arith.mulf %132, %135 : vector<8x32xf32>
    %138 = arith.addf %136, %137 : vector<8x32xf32>
    %139 = math.tanh %138 : vector<8x32xf32>
    %140 = arith.mulf %134, %139 : vector<8x32xf32>
    %c48 = arith.constant 48 : index
    %c0_30 = arith.constant 0 : index
    %141 = vector.load %arg3[%c48, %c0_30] : memref<64x32xf32, #tpu.memory_space<vmem>>, vector<8x32xf32>
    tpu.vector_store %arg3[%c48, %c0_30], %140 {strides = array<i32>} : memref<64x32xf32, #tpu.memory_space<vmem>>, vector<8x32xf32>,
    %142 = vector.extract_strided_slice %6 {offsets = [56, 0], sizes = [8, 128], strides = [1, 1]} : vector<64x128xf32> to vector<8x128xf32>
    %cst_31 = arith.constant dense<0.000000e+00> : vector<8x128xf32>
    %143 = tpu.matmul %140, %2, %cst_31 {dimension_numbers = #tpu.dot_dimension_numbers<[1], [0], [0], [1], [0, 0, 1, 1], [], []>} : vector<8x32xf32>, vector<32x128xf32>, vector<8x128xf32> -> vector<8x128xf32>
    %144 = arith.addf %142, %143 : vector<8x128xf32>
    %145 = arith.negf %144 : vector<8x128xf32>
    %146 = math.exp %145 : vector<8x128xf32>
    %cst_32 = arith.constant 1.000000e+00 : f32
    %147 = vector.broadcast %cst_32 : f32 to vector<8x128xf32>
    %148 = arith.addf %147, %146 : vector<8x128xf32>
    %149 = arith.divf %147, %148 : vector<8x128xf32>
    %150 = math.tanh %144 : vector<8x128xf32>
    %151 = vector.extract_strided_slice %149 {offsets = [0, 0], sizes = [8, 32], strides = [1, 1]} : vector<8x128xf32> to vector<8x32xf32>
    %152 = vector.extract_strided_slice %149 {offsets = [0, 32], sizes = [8, 32], strides = [1, 1]} : vector<8x128xf32> to vector<8x32xf32>
    %153 = vector.extract_strided_slice %149 {offsets = [0, 96], sizes = [8, 32], strides = [1, 1]} : vector<8x128xf32> to vector<8x32xf32>
    %154 = vector.extract_strided_slice %150 {offsets = [0, 64], sizes = [8, 32], strides = [1, 1]} : vector<8x128xf32> to vector<8x32xf32>
    %155 = arith.mulf %152, %138 : vector<8x32xf32>
    %156 = arith.mulf %151, %154 : vector<8x32xf32>
    %157 = arith.addf %155, %156 : vector<8x32xf32>
    %158 = math.tanh %157 : vector<8x32xf32>
    %159 = arith.mulf %153, %158 : vector<8x32xf32>
    %c56 = arith.constant 56 : index
    %c0_33 = arith.constant 0 : index
    %160 = vector.load %arg3[%c56, %c0_33] : memref<64x32xf32, #tpu.memory_space<vmem>>, vector<8x32xf32>
    tpu.vector_store %arg3[%c56, %c0_33], %159 {strides = array<i32>} : memref<64x32xf32, #tpu.memory_space<vmem>>, vector<8x32xf32>,
    %c0_34 = arith.constant 0 : index
    %c0_35 = arith.constant 0 : index
    %161 = vector.load %arg3[%c0_34, %c0_35] : memref<64x32xf32, #tpu.memory_space<vmem>>, vector<64x32xf32>
    %c48_36 = arith.constant 48 : index
    %c0_37 = arith.constant 0 : index
    %162 = vector.load %arg1[%c48_36, %c0_37] : memref<184x128xf32, #tpu.memory_space<vmem>>, vector<32x128xf32>
    %c80 = arith.constant 80 : index
    %c0_38 = arith.constant 0 : index
    %163 = vector.load %arg1[%c80, %c0_38] : memref<184x128xf32, #tpu.memory_space<vmem>>, vector<32x128xf32>
    %c112 = arith.constant 112 : index
    %c0_39 = arith.constant 0 : index
    %164 = vector.load %arg1[%c112, %c0_39] : memref<184x128xf32, #tpu.memory_space<vmem>>, vector<1x128xf32>
    %cst_40 = arith.constant dense<0.000000e+00> : vector<64x128xf32>
    %165 = tpu.matmul %161, %162, %cst_40 {dimension_numbers = #tpu.dot_dimension_numbers<[1], [0], [0], [1], [0, 0, 1, 1], [], []>} : vector<64x32xf32>, vector<32x128xf32>, vector<64x128xf32> -> vector<64x128xf32>
    %166 = vector.broadcast %164 : vector<1x128xf32> to vector<64x128xf32>
    %167 = arith.addf %165, %166 : vector<64x128xf32>
    %cst_41 = arith.constant 0.000000e+00 : f32
    %168 = vector.broadcast %cst_41 : f32 to vector<8x32xf32>
    %cst_42 = arith.constant 0.000000e+00 : f32
    %169 = vector.broadcast %cst_42 : f32 to vector<8x32xf32>
    %170 = vector.extract_strided_slice %167 {offsets = [0, 0], sizes = [8, 128], strides = [1, 1]} : vector<64x128xf32> to vector<8x128xf32>
    %cst_43 = arith.constant dense<0.000000e+00> : vector<8x128xf32>
    %171 = tpu.matmul %168, %163, %cst_43 {dimension_numbers = #tpu.dot_dimension_numbers<[1], [0], [0], [1], [0, 0, 1, 1], [], []>} : vector<8x32xf32>, vector<32x128xf32>, vector<8x128xf32> -> vector<8x128xf32>
    %172 = arith.addf %170, %171 : vector<8x128xf32>
    %173 = arith.negf %172 : vector<8x128xf32>
    %174 = math.exp %173 : vector<8x128xf32>
    %cst_44 = arith.constant 1.000000e+00 : f32
    %175 = vector.broadcast %cst_44 : f32 to vector<8x128xf32>
    %176 = arith.addf %175, %174 : vector<8x128xf32>
    %177 = arith.divf %175, %176 : vector<8x128xf32>
    %178 = math.tanh %172 : vector<8x128xf32>
    %179 = vector.extract_strided_slice %177 {offsets = [0, 0], sizes = [8, 32], strides = [1, 1]} : vector<8x128xf32> to vector<8x32xf32>
    %180 = vector.extract_strided_slice %177 {offsets = [0, 32], sizes = [8, 32], strides = [1, 1]} : vector<8x128xf32> to vector<8x32xf32>
    %181 = vector.extract_strided_slice %177 {offsets = [0, 96], sizes = [8, 32], strides = [1, 1]} : vector<8x128xf32> to vector<8x32xf32>
    %182 = vector.extract_strided_slice %178 {offsets = [0, 64], sizes = [8, 32], strides = [1, 1]} : vector<8x128xf32> to vector<8x32xf32>
    %183 = arith.mulf %180, %169 : vector<8x32xf32>
    %184 = arith.mulf %179, %182 : vector<8x32xf32>
    %185 = arith.addf %183, %184 : vector<8x32xf32>
    %186 = math.tanh %185 : vector<8x32xf32>
    %187 = arith.mulf %181, %186 : vector<8x32xf32>
    %188 = vector.extract_strided_slice %167 {offsets = [8, 0], sizes = [8, 128], strides = [1, 1]} : vector<64x128xf32> to vector<8x128xf32>
    %cst_45 = arith.constant dense<0.000000e+00> : vector<8x128xf32>
    %189 = tpu.matmul %187, %163, %cst_45 {dimension_numbers = #tpu.dot_dimension_numbers<[1], [0], [0], [1], [0, 0, 1, 1], [], []>} : vector<8x32xf32>, vector<32x128xf32>, vector<8x128xf32> -> vector<8x128xf32>
    %190 = arith.addf %188, %189 : vector<8x128xf32>
    %191 = arith.negf %190 : vector<8x128xf32>
    %192 = math.exp %191 : vector<8x128xf32>
    %cst_46 = arith.constant 1.000000e+00 : f32
    %193 = vector.broadcast %cst_46 : f32 to vector<8x128xf32>
    %194 = arith.addf %193, %192 : vector<8x128xf32>
    %195 = arith.divf %193, %194 : vector<8x128xf32>
    %196 = math.tanh %190 : vector<8x128xf32>
    %197 = vector.extract_strided_slice %195 {offsets = [0, 0], sizes = [8, 32], strides = [1, 1]} : vector<8x128xf32> to vector<8x32xf32>
    %198 = vector.extract_strided_slice %195 {offsets = [0, 32], sizes = [8, 32], strides = [1, 1]} : vector<8x128xf32> to vector<8x32xf32>
    %199 = vector.extract_strided_slice %195 {offsets = [0, 96], sizes = [8, 32], strides = [1, 1]} : vector<8x128xf32> to vector<8x32xf32>
    %200 = vector.extract_strided_slice %196 {offsets = [0, 64], sizes = [8, 32], strides = [1, 1]} : vector<8x128xf32> to vector<8x32xf32>
    %201 = arith.mulf %198, %185 : vector<8x32xf32>
    %202 = arith.mulf %197, %200 : vector<8x32xf32>
    %203 = arith.addf %201, %202 : vector<8x32xf32>
    %204 = math.tanh %203 : vector<8x32xf32>
    %205 = arith.mulf %199, %204 : vector<8x32xf32>
    %206 = vector.extract_strided_slice %167 {offsets = [16, 0], sizes = [8, 128], strides = [1, 1]} : vector<64x128xf32> to vector<8x128xf32>
    %cst_47 = arith.constant dense<0.000000e+00> : vector<8x128xf32>
    %207 = tpu.matmul %205, %163, %cst_47 {dimension_numbers = #tpu.dot_dimension_numbers<[1], [0], [0], [1], [0, 0, 1, 1], [], []>} : vector<8x32xf32>, vector<32x128xf32>, vector<8x128xf32> -> vector<8x128xf32>
    %208 = arith.addf %206, %207 : vector<8x128xf32>
    %209 = arith.negf %208 : vector<8x128xf32>
    %210 = math.exp %209 : vector<8x128xf32>
    %cst_48 = arith.constant 1.000000e+00 : f32
    %211 = vector.broadcast %cst_48 : f32 to vector<8x128xf32>
    %212 = arith.addf %211, %210 : vector<8x128xf32>
    %213 = arith.divf %211, %212 : vector<8x128xf32>
    %214 = math.tanh %208 : vector<8x128xf32>
    %215 = vector.extract_strided_slice %213 {offsets = [0, 0], sizes = [8, 32], strides = [1, 1]} : vector<8x128xf32> to vector<8x32xf32>
    %216 = vector.extract_strided_slice %213 {offsets = [0, 32], sizes = [8, 32], strides = [1, 1]} : vector<8x128xf32> to vector<8x32xf32>
    %217 = vector.extract_strided_slice %213 {offsets = [0, 96], sizes = [8, 32], strides = [1, 1]} : vector<8x128xf32> to vector<8x32xf32>
    %218 = vector.extract_strided_slice %214 {offsets = [0, 64], sizes = [8, 32], strides = [1, 1]} : vector<8x128xf32> to vector<8x32xf32>
    %219 = arith.mulf %216, %203 : vector<8x32xf32>
    %220 = arith.mulf %215, %218 : vector<8x32xf32>
    %221 = arith.addf %219, %220 : vector<8x32xf32>
    %222 = math.tanh %221 : vector<8x32xf32>
    %223 = arith.mulf %217, %222 : vector<8x32xf32>
    %224 = vector.extract_strided_slice %167 {offsets = [24, 0], sizes = [8, 128], strides = [1, 1]} : vector<64x128xf32> to vector<8x128xf32>
    %cst_49 = arith.constant dense<0.000000e+00> : vector<8x128xf32>
    %225 = tpu.matmul %223, %163, %cst_49 {dimension_numbers = #tpu.dot_dimension_numbers<[1], [0], [0], [1], [0, 0, 1, 1], [], []>} : vector<8x32xf32>, vector<32x128xf32>, vector<8x128xf32> -> vector<8x128xf32>
    %226 = arith.addf %224, %225 : vector<8x128xf32>
    %227 = arith.negf %226 : vector<8x128xf32>
    %228 = math.exp %227 : vector<8x128xf32>
    %cst_50 = arith.constant 1.000000e+00 : f32
    %229 = vector.broadcast %cst_50 : f32 to vector<8x128xf32>
    %230 = arith.addf %229, %228 : vector<8x128xf32>
    %231 = arith.divf %229, %230 : vector<8x128xf32>
    %232 = math.tanh %226 : vector<8x128xf32>
    %233 = vector.extract_strided_slice %231 {offsets = [0, 0], sizes = [8, 32], strides = [1, 1]} : vector<8x128xf32> to vector<8x32xf32>
    %234 = vector.extract_strided_slice %231 {offsets = [0, 32], sizes = [8, 32], strides = [1, 1]} : vector<8x128xf32> to vector<8x32xf32>
    %235 = vector.extract_strided_slice %231 {offsets = [0, 96], sizes = [8, 32], strides = [1, 1]} : vector<8x128xf32> to vector<8x32xf32>
    %236 = vector.extract_strided_slice %232 {offsets = [0, 64], sizes = [8, 32], strides = [1, 1]} : vector<8x128xf32> to vector<8x32xf32>
    %237 = arith.mulf %234, %221 : vector<8x32xf32>
    %238 = arith.mulf %233, %236 : vector<8x32xf32>
    %239 = arith.addf %237, %238 : vector<8x32xf32>
    %240 = math.tanh %239 : vector<8x32xf32>
    %241 = arith.mulf %235, %240 : vector<8x32xf32>
    %242 = vector.extract_strided_slice %167 {offsets = [32, 0], sizes = [8, 128], strides = [1, 1]} : vector<64x128xf32> to vector<8x128xf32>
    %cst_51 = arith.constant dense<0.000000e+00> : vector<8x128xf32>
    %243 = tpu.matmul %241, %163, %cst_51 {dimension_numbers = #tpu.dot_dimension_numbers<[1], [0], [0], [1], [0, 0, 1, 1], [], []>} : vector<8x32xf32>, vector<32x128xf32>, vector<8x128xf32> -> vector<8x128xf32>
    %244 = arith.addf %242, %243 : vector<8x128xf32>
    %245 = arith.negf %244 : vector<8x128xf32>
    %246 = math.exp %245 : vector<8x128xf32>
    %cst_52 = arith.constant 1.000000e+00 : f32
    %247 = vector.broadcast %cst_52 : f32 to vector<8x128xf32>
    %248 = arith.addf %247, %246 : vector<8x128xf32>
    %249 = arith.divf %247, %248 : vector<8x128xf32>
    %250 = math.tanh %244 : vector<8x128xf32>
    %251 = vector.extract_strided_slice %249 {offsets = [0, 0], sizes = [8, 32], strides = [1, 1]} : vector<8x128xf32> to vector<8x32xf32>
    %252 = vector.extract_strided_slice %249 {offsets = [0, 32], sizes = [8, 32], strides = [1, 1]} : vector<8x128xf32> to vector<8x32xf32>
    %253 = vector.extract_strided_slice %249 {offsets = [0, 96], sizes = [8, 32], strides = [1, 1]} : vector<8x128xf32> to vector<8x32xf32>
    %254 = vector.extract_strided_slice %250 {offsets = [0, 64], sizes = [8, 32], strides = [1, 1]} : vector<8x128xf32> to vector<8x32xf32>
    %255 = arith.mulf %252, %239 : vector<8x32xf32>
    %256 = arith.mulf %251, %254 : vector<8x32xf32>
    %257 = arith.addf %255, %256 : vector<8x32xf32>
    %258 = math.tanh %257 : vector<8x32xf32>
    %259 = arith.mulf %253, %258 : vector<8x32xf32>
    %260 = vector.extract_strided_slice %167 {offsets = [40, 0], sizes = [8, 128], strides = [1, 1]} : vector<64x128xf32> to vector<8x128xf32>
    %cst_53 = arith.constant dense<0.000000e+00> : vector<8x128xf32>
    %261 = tpu.matmul %259, %163, %cst_53 {dimension_numbers = #tpu.dot_dimension_numbers<[1], [0], [0], [1], [0, 0, 1, 1], [], []>} : vector<8x32xf32>, vector<32x128xf32>, vector<8x128xf32> -> vector<8x128xf32>
    %262 = arith.addf %260, %261 : vector<8x128xf32>
    %263 = arith.negf %262 : vector<8x128xf32>
    %264 = math.exp %263 : vector<8x128xf32>
    %cst_54 = arith.constant 1.000000e+00 : f32
    %265 = vector.broadcast %cst_54 : f32 to vector<8x128xf32>
    %266 = arith.addf %265, %264 : vector<8x128xf32>
    %267 = arith.divf %265, %266 : vector<8x128xf32>
    %268 = math.tanh %262 : vector<8x128xf32>
    %269 = vector.extract_strided_slice %267 {offsets = [0, 0], sizes = [8, 32], strides = [1, 1]} : vector<8x128xf32> to vector<8x32xf32>
    %270 = vector.extract_strided_slice %267 {offsets = [0, 32], sizes = [8, 32], strides = [1, 1]} : vector<8x128xf32> to vector<8x32xf32>
    %271 = vector.extract_strided_slice %267 {offsets = [0, 96], sizes = [8, 32], strides = [1, 1]} : vector<8x128xf32> to vector<8x32xf32>
    %272 = vector.extract_strided_slice %268 {offsets = [0, 64], sizes = [8, 32], strides = [1, 1]} : vector<8x128xf32> to vector<8x32xf32>
    %273 = arith.mulf %270, %257 : vector<8x32xf32>
    %274 = arith.mulf %269, %272 : vector<8x32xf32>
    %275 = arith.addf %273, %274 : vector<8x32xf32>
    %276 = math.tanh %275 : vector<8x32xf32>
    %277 = arith.mulf %271, %276 : vector<8x32xf32>
    %278 = vector.extract_strided_slice %167 {offsets = [48, 0], sizes = [8, 128], strides = [1, 1]} : vector<64x128xf32> to vector<8x128xf32>
    %cst_55 = arith.constant dense<0.000000e+00> : vector<8x128xf32>
    %279 = tpu.matmul %277, %163, %cst_55 {dimension_numbers = #tpu.dot_dimension_numbers<[1], [0], [0], [1], [0, 0, 1, 1], [], []>} : vector<8x32xf32>, vector<32x128xf32>, vector<8x128xf32> -> vector<8x128xf32>
    %280 = arith.addf %278, %279 : vector<8x128xf32>
    %281 = arith.negf %280 : vector<8x128xf32>
    %282 = math.exp %281 : vector<8x128xf32>
    %cst_56 = arith.constant 1.000000e+00 : f32
    %283 = vector.broadcast %cst_56 : f32 to vector<8x128xf32>
    %284 = arith.addf %283, %282 : vector<8x128xf32>
    %285 = arith.divf %283, %284 : vector<8x128xf32>
    %286 = math.tanh %280 : vector<8x128xf32>
    %287 = vector.extract_strided_slice %285 {offsets = [0, 0], sizes = [8, 32], strides = [1, 1]} : vector<8x128xf32> to vector<8x32xf32>
    %288 = vector.extract_strided_slice %285 {offsets = [0, 32], sizes = [8, 32], strides = [1, 1]} : vector<8x128xf32> to vector<8x32xf32>
    %289 = vector.extract_strided_slice %285 {offsets = [0, 96], sizes = [8, 32], strides = [1, 1]} : vector<8x128xf32> to vector<8x32xf32>
    %290 = vector.extract_strided_slice %286 {offsets = [0, 64], sizes = [8, 32], strides = [1, 1]} : vector<8x128xf32> to vector<8x32xf32>
    %291 = arith.mulf %288, %275 : vector<8x32xf32>
    %292 = arith.mulf %287, %290 : vector<8x32xf32>
    %293 = arith.addf %291, %292 : vector<8x32xf32>
    %294 = math.tanh %293 : vector<8x32xf32>
    %295 = arith.mulf %289, %294 : vector<8x32xf32>
    %296 = vector.extract_strided_slice %167 {offsets = [56, 0], sizes = [8, 128], strides = [1, 1]} : vector<64x128xf32> to vector<8x128xf32>
    %cst_57 = arith.constant dense<0.000000e+00> : vector<8x128xf32>
    %297 = tpu.matmul %295, %163, %cst_57 {dimension_numbers = #tpu.dot_dimension_numbers<[1], [0], [0], [1], [0, 0, 1, 1], [], []>} : vector<8x32xf32>, vector<32x128xf32>, vector<8x128xf32> -> vector<8x128xf32>
    %298 = arith.addf %296, %297 : vector<8x128xf32>
    %299 = arith.negf %298 : vector<8x128xf32>
    %300 = math.exp %299 : vector<8x128xf32>
    %cst_58 = arith.constant 1.000000e+00 : f32
    %301 = vector.broadcast %cst_58 : f32 to vector<8x128xf32>
    %302 = arith.addf %301, %300 : vector<8x128xf32>
    %303 = arith.divf %301, %302 : vector<8x128xf32>
    %304 = math.tanh %298 : vector<8x128xf32>
    %305 = vector.extract_strided_slice %303 {offsets = [0, 0], sizes = [8, 32], strides = [1, 1]} : vector<8x128xf32> to vector<8x32xf32>
    %306 = vector.extract_strided_slice %303 {offsets = [0, 32], sizes = [8, 32], strides = [1, 1]} : vector<8x128xf32> to vector<8x32xf32>
    %307 = vector.extract_strided_slice %303 {offsets = [0, 96], sizes = [8, 32], strides = [1, 1]} : vector<8x128xf32> to vector<8x32xf32>
    %308 = vector.extract_strided_slice %304 {offsets = [0, 64], sizes = [8, 32], strides = [1, 1]} : vector<8x128xf32> to vector<8x32xf32>
    %309 = arith.mulf %306, %293 : vector<8x32xf32>
    %310 = arith.mulf %305, %308 : vector<8x32xf32>
    %311 = arith.addf %309, %310 : vector<8x32xf32>
    %312 = math.tanh %311 : vector<8x32xf32>
    %313 = arith.mulf %307, %312 : vector<8x32xf32>
    %c120 = arith.constant 120 : index
    %c0_59 = arith.constant 0 : index
    %314 = vector.load %arg1[%c120, %c0_59] : memref<184x128xf32, #tpu.memory_space<vmem>>, vector<32x16xf32>
    %c152 = arith.constant 152 : index
    %c0_60 = arith.constant 0 : index
    %315 = vector.load %arg1[%c152, %c0_60] : memref<184x128xf32, #tpu.memory_space<vmem>>, vector<1x16xf32>
    %cst_61 = arith.constant dense<0.000000e+00> : vector<8x16xf32>
    %316 = tpu.matmul %313, %314, %cst_61 {dimension_numbers = #tpu.dot_dimension_numbers<[1], [0], [0], [1], [0, 0, 1, 1], [], []>} : vector<8x32xf32>, vector<32x16xf32>, vector<8x16xf32> -> vector<8x16xf32>
    %317 = vector.broadcast %315 : vector<1x16xf32> to vector<8x16xf32>
    %318 = arith.addf %316, %317 : vector<8x16xf32>
    %cst_62 = arith.constant 0.000000e+00 : f32
    %319 = vector.broadcast %cst_62 : f32 to vector<8x16xf32>
    %320 = arith.maximumf %318, %319 : vector<8x16xf32>
    %c160 = arith.constant 160 : index
    %c0_63 = arith.constant 0 : index
    %321 = vector.load %arg1[%c160, %c0_63] : memref<184x128xf32, #tpu.memory_space<vmem>>, vector<16x128xf32>
    %c176 = arith.constant 176 : index
    %c0_64 = arith.constant 0 : index
    %322 = vector.load %arg1[%c176, %c0_64] : memref<184x128xf32, #tpu.memory_space<vmem>>, vector<1x128xf32>
    %cst_65 = arith.constant dense<0.000000e+00> : vector<8x128xf32>
    %323 = tpu.matmul %320, %321, %cst_65 {dimension_numbers = #tpu.dot_dimension_numbers<[1], [0], [0], [1], [0, 0, 1, 1], [], []>} : vector<8x16xf32>, vector<16x128xf32>, vector<8x128xf32> -> vector<8x128xf32>
    %324 = vector.broadcast %322 : vector<1x128xf32> to vector<8x128xf32>
    %325 = arith.addf %323, %324 : vector<8x128xf32>
    %c0_66 = arith.constant 0 : index
    %c0_67 = arith.constant 0 : index
    %326 = vector.load %arg2[%c0_66, %c0_67] : memref<8x128xf32, #tpu.memory_space<vmem>>, vector<8x128xf32>
    tpu.vector_store %arg2[%c0_66, %c0_67], %325 {strides = array<i32>} : memref<8x128xf32, #tpu.memory_space<vmem>>, vector<8x128xf32>,
    return
  }
}

</mosaic_0001>

<bundles_post_ra>
// kernel: lstm_predictor_forward.1
= control target key start
LH: loop header
LB: loop body
LE: loop exit
PB: predicated region body
PF: predicated region fallthrough
CT: control target
= control target key end

     0   :  { %7 = vsyncpa [#allocation4], 0  ;;  %s2775_s9 = smov [#allocation3]   ;;  %s3110_s0 = inlined_call_operand.vmem [shape: f32[64,4], index: 0, kind: input, shape index: {}]   ;;  %s3111_s1 = inlined_call_operand.hbm [shape: f32[184,128], index: 1, kind: input, shape index: {}]   ;;  %s3112_s2 = inlined_call_operand.vmem [shape: f32[8,128], index: 2, kind: output, shape index: {}]  }
   0x1   :  { %s15_s10 = sshll.u32 %s2775_s9, 4  ;;  %s2751_s13 = scalar_lea.hbm %s3111_s1, 2944  ;;  %s16_s10 = int_to_ptr.vmem [resolvable:$true] %s15_s10 }
   0x2   :  { %p2752_p0 = scmp.ne.s32.totalorder %s3111_s1, %s2751_s13  ;;  %p2755_p1 = scmp.lt.u32.totalorder %s2751_s13, %s3111_s1 }
   0x4   :  { %p2757_p2 = pnand %p2755_p1, %p2752_p0 }
   0x6   :  { %2760 = shalt.err (!%p2757_p2)
}
   0x7   :  { %s2761_s18 = scalar_lea.vmem %s16_s10, 2944  ;;  %p2766_p4 = scmp.lt.s32.totalorder %s16_s10, %s16_s10 }
   0x8   :  { %p2762_p3 = scmp.ne.s32.totalorder %s16_s10, %s2761_s18  ;;  %p2767_p5 = scmp.lt.s32.totalorder %s2761_s18, %s2761_s18 }
   0xa   :  { %p2768_p6 = por %p2767_p5, %p2766_p4 }
   0xc   :  { %p2769_p7 = pnand %p2768_p6, %p2762_p3 }
   0xe   :  { %2772 = shalt.err (!%p2769_p7)
}
   0xf   :  { %s2776_s19 = smov 128   ;;  %s2777_s20 = smov 8  }
  0x10   :  { %21 = dma.hbm_to_vmem [thread:$0]  %s3111_s1, 2944, %s16_s10, [#allocation4], %s2776_s19, %s2776_s19, %s2777_s20  }
  0x11   :  { %2773 = dma.done.wait [#allocation4], 2944  }
  0x12   :  { %2774 = vsyncadd [#allocation4], 4294964352  ;;  %v2778_v0 = vmov 0.0|0.0   ;;  %vm2779_vm0 = vmmov 0   ;;  %v2780_v1 = vmov 0.0   ;;  %vm68_vm1 = vcmask 1043456  }
  0x13   :  { %2502 = vmatprep.subr.bf16.mxu1 %v2778_v0  ;;  %2296 = vmatprep.mubr.msk.f32.mxu1 %vm2779_vm0, %v2780_v1  ;;  %vm43_vm2 = vcmask 31744   ;;  %v34_v2 = vld [vmem:[#allocation3 + $0x8] sm:$0xff]  ;;  %v35_v3 = vld [vmem:[#allocation3 + $0x10] sm:$0xff]  ;;  %v33_v4 = vld [vmem:[#allocation3] sm:$0xf]  ;;  %s2781_s26 = smov 64  }
  0x14   :  { %v2813_v5 = vpack.c.bf16 %v35_v3, %v34_v2  ;;  %2274 = vmatprep.subr.msk.mxu0 %vm68_vm1, %v33_v4  ;;  %v25_v6 = vld [vmem:[%s3110_s0] sm:$0xff]  ;;  %v26_v7 = vld [vmem:[%s3110_s0 + $0x8] sm:$0xff]  ;;  %v36_v8 = vld [vmem:[#allocation3 + $0x18] sm:$0xff]  ;;  %s2782_s27 = smov 32   ;;  %vm177_vm3 = vcmask 261120   ;;  %vm2032_vm4 = vcmask 130048  }
  0x15   :  { %2275 = vmatpush3.msk.msra.mxu0 %vm68_vm1, %v33_v4  ;;  %2276 = vmatprep.mubr.msk.f32.mxu0 %vm43_vm2, %v25_v6  ;;  %v37_v9 = vld [vmem:[#allocation3 + $0x20] sm:$0xff]  ;;  %v2841_v12 = vld [vmem:[#allocation3 + $0x28] ss:$0 sm:$0xff]  ;;  %v27_v46 = vld [vmem:[%s3110_s0 + $0x10] sm:$0xff] }
  0x16   :  { %2504 = vmatpush3.bf16.msra.mxu1 %v2813_v5  ;;  %2277 = vmatmul.mubr.msk.f32.vlgmr.msra.gmra.mrb[0].mxu0 %vm43_vm2, %v26_v7  ;;  %v2824_v10 = vpack.c.bf16 %v37_v9, %v36_v8  ;;  %v28_v47 = vld [vmem:[%s3110_s0 + $0x18] sm:$0xff]  ;;  %v29_v48 = vld [vmem:[%s3110_s0 + $0x20] sm:$0xff]  ;;  %v30_v49 = vld [vmem:[%s3110_s0 + $0x28] sm:$0xff] }
  0x17   :  { %2505 = vmatprep.subr.bf16.mxu1 %v2778_v0  ;;  %2514 = vmatprep.subr.bf16.mxu0 %v2778_v0  ;;  %v31_v50 = vld [vmem:[%s3110_s0 + $0x30] sm:$0xff]  ;;  %v32_v51 = vld [vmem:[%s3110_s0 + $0x38] sm:$0xff] }
  0x18   :  { %2516 = vmatpush3.bf16.msra.mxu0 %v2813_v5  ;;  %2279 = vmatprep.mubr.msk.f32.mxu0 %vm43_vm2, %v27_v46 }
  0x19   :  { %2517 = vmatprep.subr.bf16.mxu0 %v2778_v0 }
  0x1a   :  { %2507 = vmatpush3.bf16.msra.mxu1 %v2824_v10  ;;  %2280 = vmatmul.mubr.msk.f32.gmra.mrb[2].mxu0 %vm43_vm2, %v28_v47 }
  0x1b   :  { %2508 = vmatprep.subr.bf16.mxu1 %v2778_v0  ;;  %2282 = vmatprep.mubr.msk.f32.mxu0 %vm43_vm2, %v29_v48 }
  0x1c   :  { %2519 = vmatpush3.bf16.msra.mxu0 %v2824_v10 }
  0x1d   :  { %2297 = vmatmul.mubr.f32.vlgmr.msra.gmra.mrb[0].mxu1 %v2780_v1  ;;  %2526 = vmatprep.subr.bf16.mxu0 %v2778_v0 }
  0x1e   :  { %2510 = vmatpush3.bf16.msra.mxu1 %v2813_v5  ;;  %2307 = vmatprep.mubr.msk.f32.mxu1 %vm2779_vm0, %v2780_v1 }
  0x1f   :  { %2511 = vmatprep.subr.bf16.mxu1 %v2778_v0  ;;  %2283 = vmatmul.mubr.msk.f32.gmra.mrb[4].mxu0 %vm43_vm2, %v30_v49 }
  0x20   :  { %2285 = vmatprep.mubr.msk.f32.mxu0 %vm43_vm2, %v31_v50 }
  0x22   :  { %2513 = vmatpush3.bf16.msra.mxu1 %v2824_v10 }
  0x23   :  { %2520 = vmatprep.subr.bf16.mxu1 %v2778_v0  ;;  %2286 = vmatmul.mubr.msk.f32.gmra.mrb[6].mxu0 %vm43_vm2, %v32_v51 }
  0x24   :  { %2318 = vmatprep.mubr.msk.f32.mxu0 %vm2779_vm0, %v2780_v1 }
  0xe9   :  { %v2278_v11 = vpop.f32.mrb[0].mxu0 }
  0xea   :  { %v138_v13 = vpop.f32.mrb[1].mxu0  ;;  %v144_v32 = vadd.f32 %v2278_v11, %v2841_v12 }
  0xeb   :  { %v139_v14 = vadd.f32 %v2841_v12, %v138_v13 }
  0xed   :  { %v2281_v55 = vpop.f32.mrb[2].mxu0 }
  0xee   :  { %v148_v56 = vpop.f32.mrb[3].mxu0 }
  0xef   :  { %v149_v62 = vadd.f32 %v2841_v12, %v148_v56 }
  0xf0   :  { %v247_v15 = vpop.f32.mrb[0].mxu1 }
  0xf1   :  { %v251_v16 = vadd.f32 %v247_v15, %v139_v14  ;;  %v2298_v17 = vpop.f32.mrb[1].mxu1 }
  0xf2   :  { %v2887_v57 = vpop.f32.mrb[4].mxu0 }
  0xf3   :  { %2623 = vtanh.f32 %v251_v16  ;;  %v2122_v19 = vmul.f32 -1.442695, %v251_v16  ;;  %v2889_v58 = vpop.f32.mrb[5].mxu0 }
  0xf5   :  { %2625 = vpow2.f32 %v2122_v19 }
  0xf6   :  { %v2891_v59 = vpop.f32.mrb[6].mxu0 }
  0xf7   :  { %v2893_v60 = vpop.f32.mrb[7].mxu0 }
  0xfd   :  { %v2624_v18 = vpop.eup %2623 }
  0xfe   :  { %261 = vrot.lane.b32.xlu0 %v2624_v18, %s2781_s26 }
  0xff   :  { %v2626_v20 = vpop.eup %2625 }
 0x100   :  { %v255_v21 = vadd.f32 1.0, %v2626_v20 }
 0x102   :  { %2627 = vrcp.f32 %v255_v21  ;;  %v154_v21 = vadd.f32 %v2281_v55, %v2841_v12 }
 0x10c   :  { %v2628_v22 = vpop.eup %2627 }
 0x10d   :  { %v259_v25 = vmul.f32 0.0, %v2628_v22 }
 0x170   :  { %v262_v23 = vpop.permute.xlu0 %261 }
 0x171   :  { %v264_v24 = vmul.f32 %v2628_v22, %v262_v23 }
 0x173   :  { %266 = vrot.lane.b32.xlu0 %v264_v24, %s2782_s27 }
 0x1e5   :  { %v267_v26 = vpop.permute.xlu0 %266 }
 0x1e6   :  { %v269_v27 = vadd.f32 %v267_v26, %v259_v25 }
 0x1e8   :  { %2629 = vtanh.f32 %v269_v27 }
 0x1f2   :  { %v2630_v28 = vpop.eup %2629 }
 0x1f3   :  { %272 = vrot.lane.b32.xlu1 %v2630_v28, %s2781_s26 }
 0x265   :  { %v273_v29 = vpop.permute.xlu1 %272 }
 0x266   :  { %v275_v30 = vmul.f32 %v2628_v22, %v273_v29 }
 0x268   :  { %277 = vrot.lane.b32.xlu1 %v275_v30, %s2782_s27 }
 0x2da   :  { %v278_v31 = vpop.permute.xlu1 %277 }
 0x2db   :  { %280 = vst.msk [vmem:[#allocation2] sm:$0xff] %vm177_vm3, %v278_v31  ;;  %2308 = vmatmul.mubr.msk.f32.vlgmr.msra.gmra.mrb[2].mxu1 %vm177_vm3, %v278_v31 }
 0x2dc   :  { %2522 = vmatpush3.bf16.msra.mxu1 %v2813_v5  ;;  %2329 = vmatprep.mubr.msk.f32.mxu1 %vm2779_vm0, %v2780_v1 }
 0x2dd   :  { %2523 = vmatprep.subr.bf16.mxu1 %v2778_v0 }
 0x2e0   :  { %2525 = vmatpush3.bf16.msra.mxu1 %v2824_v10 }
 0x2e1   :  { %2532 = vmatprep.subr.bf16.mxu1 %v2778_v0 }
 0x3ae   :  { %v349_v33 = vpop.f32.mrb[2].mxu1 }
 0x3af   :  { %v353_v34 = vadd.f32 %v349_v33, %v144_v32  ;;  %v2309_v35 = vpop.f32.mrb[3].mxu1 }
 0x3b1   :  { %2631 = vtanh.f32 %v353_v34  ;;  %v2124_v37 = vmul.f32 -1.442695, %v353_v34 }
 0x3b3   :  { %2633 = vpow2.f32 %v2124_v37 }
 0x3bb   :  { %v2632_v36 = vpop.eup %2631 }
 0x3bc   :  { %363 = vrot.lane.b32.xlu0 %v2632_v36, %s2781_s26 }
 0x3bd   :  { %v2634_v38 = vpop.eup %2633 }
 0x3be   :  { %v357_v39 = vadd.f32 1.0, %v2634_v38 }
 0x3c0   :  { %2635 = vrcp.f32 %v357_v39  ;;  %v159_v39 = vadd.f32 %v2841_v12, %v2889_v58  ;;  %v164_v58 = vadd.f32 %v2887_v57, %v2841_v12 }
 0x3ca   :  { %v2636_v40 = vpop.eup %2635 }
 0x3cb   :  { %v361_v43 = vmul.f32 %v2636_v40, %v269_v27 }
 0x42e   :  { %v364_v41 = vpop.permute.xlu0 %363 }
 0x42f   :  { %v366_v42 = vmul.f32 %v2636_v40, %v364_v41 }
 0x431   :  { %368 = vrot.lane.b32.xlu1 %v366_v42, %s2782_s27 }
 0x4a3   :  { %v369_v44 = vpop.permute.xlu1 %368 }
 0x4a4   :  { %v371_v45 = vadd.f32 %v369_v44, %v361_v43 }
 0x4a6   :  { %2637 = vtanh.f32 %v371_v45 }
 0x4b0   :  { %v2638_v52 = vpop.eup %2637 }
 0x4b1   :  { %374 = vrot.lane.b32.xlu0 %v2638_v52, %s2781_s26 }
 0x523   :  { %v375_v53 = vpop.permute.xlu0 %374 }
 0x524   :  { %v377_v54 = vmul.f32 %v2636_v40, %v375_v53 }
 0x526   :  { %379 = vrot.lane.b32.xlu1 %v377_v54, %s2782_s27 }
 0x598   :  { %v380_v61 = vpop.permute.xlu1 %379 }
 0x599   :  { %382 = vst.msk [vmem:[#allocation2 + $0x8] sm:$0xff] %vm177_vm3, %v380_v61  ;;  %2319 = vmatmul.mubr.msk.f32.vlgmr.msra.gmra.mrb[8].mxu0 %vm177_vm3, %v380_v61 }
 0x59a   :  { %2528 = vmatpush3.bf16.msra.mxu0 %v2813_v5  ;;  %2340 = vmatprep.mubr.msk.f32.mxu0 %vm2779_vm0, %v2780_v1 }
 0x59b   :  { %2529 = vmatprep.subr.bf16.mxu0 %v2778_v0 }
 0x59e   :  { %2531 = vmatpush3.bf16.msra.mxu0 %v2824_v10 }
 0x59f   :  { %2538 = vmatprep.subr.bf16.mxu0 %v2778_v0 }
 0x66c   :  { %v451_v63 = vpop.f32.mrb[8].mxu0 }
 0x66d   :  { %v455_v2 = vadd.f32 %v451_v63, %v149_v62  ;;  %v2320_v3 = vpop.f32.mrb[9].mxu0 }
 0x66f   :  { %2639 = vtanh.f32 %v455_v2  ;;  %v2126_v6 = vmul.f32 -1.442695, %v455_v2 }
 0x671   :  { %2641 = vpow2.f32 %v2126_v6 }
 0x679   :  { %v2640_v4 = vpop.eup %2639 }
 0x67a   :  { %465 = vrot.lane.b32.xlu0 %v2640_v4, %s2781_s26 }
 0x67b   :  { %v2642_v7 = vpop.eup %2641 }
 0x67c   :  { %v459_v8 = vadd.f32 1.0, %v2642_v7 }
 0x67e   :  { %2643 = vrcp.f32 %v459_v8 }
 0x688   :  { %v2644_v9 = vpop.eup %2643 }
 0x689   :  { %v463_v14 = vmul.f32 %v2644_v9, %v371_v45 }
 0x6ec   :  { %v466_v11 = vpop.permute.xlu0 %465 }
 0x6ed   :  { %v468_v13 = vmul.f32 %v2644_v9, %v466_v11  ;;  %v1003_v11 = vld [vmem:[#allocation3 + $0x30] sm:$0xff] }
 0x6ef   :  { %470 = vrot.lane.b32.xlu1 %v468_v13, %s2782_s27  ;;  %v1004_v13 = vld [vmem:[#allocation3 + $0x38] sm:$0xff] }
 0x761   :  { %v471_v15 = vpop.permute.xlu1 %470 }
 0x762   :  { %v473_v16 = vadd.f32 %v471_v15, %v463_v14  ;;  %v2550_v14 = vpack.c.bf16 %v1004_v13, %v1003_v11 }
 0x764   :  { %2645 = vtanh.f32 %v473_v16 }
 0x76e   :  { %v2646_v17 = vpop.eup %2645 }
 0x76f   :  { %476 = vrot.lane.b32.xlu0 %v2646_v17, %s2781_s26 }
 0x7e1   :  { %v477_v18 = vpop.permute.xlu0 %476 }
 0x7e2   :  { %v479_v19 = vmul.f32 %v2644_v9, %v477_v18  ;;  %v1005_v18 = vld [vmem:[#allocation3 + $0x40] sm:$0xff] }
 0x7e4   :  { %481 = vrot.lane.b32.xlu1 %v479_v19, %s2782_s27  ;;  %v1006_v19 = vld [vmem:[#allocation3 + $0x48] sm:$0xff] }
 0x856   :  { %v482_v20 = vpop.permute.xlu1 %481 }
 0x857   :  { %484 = vst.msk [vmem:[#allocation2 + $0x10] sm:$0xff] %vm177_vm3, %v482_v20  ;;  %2330 = vmatmul.mubr.msk.f32.vlgmr.msra.gmra.mrb[4].mxu1 %vm177_vm3, %v482_v20  ;;  %v2554_v20 = vpack.c.bf16 %v1006_v19, %v1005_v18 }
 0x858   :  { %2534 = vmatpush3.bf16.msra.mxu1 %v2813_v5  ;;  %2351 = vmatprep.mubr.msk.f32.mxu1 %vm2779_vm0, %v2780_v1 }
 0x859   :  { %2535 = vmatprep.subr.bf16.mxu1 %v2778_v0 }
 0x85c   :  { %2537 = vmatpush3.bf16.msra.mxu1 %v2824_v10 }
 0x85d   :  { %2544 = vmatprep.subr.bf16.mxu1 %v2778_v0 }
 0x92a   :  { %v553_v22 = vpop.f32.mrb[4].mxu1 }
 0x92b   :  { %v557_v23 = vadd.f32 %v553_v22, %v154_v21  ;;  %v2331_v24 = vpop.f32.mrb[5].mxu1  ;;  %v995_v22 = vld [vmem:[#allocation2] sm:$0xff] }
 0x92c   :  { %v997_v24 = vld [vmem:[#allocation2 + $0x10] sm:$0xff] }
 0x92d   :  { %2647 = vtanh.f32 %v557_v23  ;;  %v2128_v26 = vmul.f32 -1.442695, %v557_v23  ;;  %v996_v23 = vld [vmem:[#allocation2 + $0x8] sm:$0xff] }
 0x92f   :  { %2649 = vpow2.f32 %v2128_v26 }
 0x937   :  { %v2648_v25 = vpop.eup %2647 }
 0x938   :  { %567 = vrot.lane.b32.xlu0 %v2648_v25, %s2781_s26 }
 0x939   :  { %v2650_v27 = vpop.eup %2649 }
 0x93a   :  { %v561_v28 = vadd.f32 1.0, %v2650_v27 }
 0x93c   :  { %2651 = vrcp.f32 %v561_v28  ;;  %v169_v28 = vadd.f32 %v2841_v12, %v2893_v60 }
 0x946   :  { %v2652_v29 = vpop.eup %2651 }
 0x947   :  { %v565_v32 = vmul.f32 %v2652_v29, %v473_v16 }
 0x9aa   :  { %v568_v30 = vpop.permute.xlu0 %567 }
 0x9ab   :  { %v570_v31 = vmul.f32 %v2652_v29, %v568_v30 }
 0x9ad   :  { %572 = vrot.lane.b32.xlu1 %v570_v31, %s2782_s27 }
 0xa1f   :  { %v573_v33 = vpop.permute.xlu1 %572 }
 0xa20   :  { %v575_v34 = vadd.f32 %v573_v33, %v565_v32 }
 0xa22   :  { %2653 = vtanh.f32 %v575_v34 }
 0xa2c   :  { %v2654_v35 = vpop.eup %2653 }
 0xa2d   :  { %578 = vrot.lane.b32.xlu0 %v2654_v35, %s2781_s26 }
 0xa9f   :  { %v579_v36 = vpop.permute.xlu0 %578 }
 0xaa0   :  { %v581_v37 = vmul.f32 %v2652_v29, %v579_v36 }
 0xaa2   :  { %583 = vrot.lane.b32.xlu1 %v581_v37, %s2782_s27 }
 0xb14   :  { %v584_v38 = vpop.permute.xlu1 %583 }
 0xb15   :  { %586 = vst.msk [vmem:[#allocation2 + $0x18] sm:$0xff] %vm177_vm3, %v584_v38  ;;  %2341 = vmatmul.mubr.msk.f32.vlgmr.msra.gmra.mrb[10].mxu0 %vm177_vm3, %v584_v38 }
 0xb16   :  { %2540 = vmatpush3.bf16.msra.mxu0 %v2813_v5  ;;  %2362 = vmatprep.mubr.msk.f32.mxu0 %vm2779_vm0, %v2780_v1 }
 0xb17   :  { %2541 = vmatprep.subr.bf16.mxu0 %v2778_v0 }
 0xb1a   :  { %2543 = vmatpush3.bf16.msra.mxu0 %v2824_v10 }
 0xb1b   :  { %2551 = vmatprep.subr.bf16.mxu0 %v2550_v14 }
 0xb1c   :  { %v998_v25 = vld [vmem:[#allocation2 + $0x18] sm:$0xff] }
 0xbe8   :  { %v655_v40 = vpop.f32.mrb[10].mxu0 }
 0xbe9   :  { %v659_v41 = vadd.f32 %v655_v40, %v159_v39  ;;  %v2342_v42 = vpop.f32.mrb[11].mxu0 }
 0xbeb   :  { %2655 = vtanh.f32 %v659_v41  ;;  %v2130_v44 = vmul.f32 -1.442695, %v659_v41 }
 0xbed   :  { %2657 = vpow2.f32 %v2130_v44 }
 0xbf5   :  { %v2656_v43 = vpop.eup %2655 }
 0xbf6   :  { %669 = vrot.lane.b32.xlu0 %v2656_v43, %s2781_s26 }
 0xbf7   :  { %v2658_v45 = vpop.eup %2657 }
 0xbf8   :  { %v663_v46 = vadd.f32 1.0, %v2658_v45 }
 0xbfa   :  { %2659 = vrcp.f32 %v663_v46 }
 0xc04   :  { %v2660_v47 = vpop.eup %2659 }
 0xc05   :  { %v667_v50 = vmul.f32 %v2660_v47, %v575_v34 }
 0xc68   :  { %v670_v48 = vpop.permute.xlu0 %669 }
 0xc69   :  { %v672_v49 = vmul.f32 %v2660_v47, %v670_v48  ;;  %v1007_v48 = vld [vmem:[#allocation3 + $0x50] sm:$0xff] }
 0xc6b   :  { %674 = vrot.lane.b32.xlu1 %v672_v49, %s2782_s27  ;;  %v1008_v49 = vld [vmem:[#allocation3 + $0x58] sm:$0xff] }
 0xcdd   :  { %v675_v51 = vpop.permute.xlu1 %674 }
 0xcde   :  { %v677_v52 = vadd.f32 %v675_v51, %v667_v50  ;;  %v2975_v50 = vpack.c.bf16 %v1008_v49, %v1007_v48  ;;  %v1009_v51 = vld [vmem:[#allocation3 + $0x60] sm:$0xff] }
 0xce0   :  { %2661 = vtanh.f32 %v677_v52 }
 0xcea   :  { %v2662_v53 = vpop.eup %2661 }
 0xceb   :  { %680 = vrot.lane.b32.xlu0 %v2662_v53, %s2781_s26 }
 0xd5d   :  { %v681_v54 = vpop.permute.xlu0 %680 }
 0xd5e   :  { %v683_v55 = vmul.f32 %v2660_v47, %v681_v54 }
 0xd60   :  { %685 = vrot.lane.b32.xlu1 %v683_v55, %s2782_s27 }
 0xdd2   :  { %v686_v56 = vpop.permute.xlu1 %685 }
 0xdd3   :  { %688 = vst.msk [vmem:[#allocation2 + $0x20] sm:$0xff] %vm177_vm3, %v686_v56  ;;  %2352 = vmatmul.mubr.msk.f32.vlgmr.msra.gmra.mrb[6].mxu1 %vm177_vm3, %v686_v56 }
 0xdd4   :  { %2546 = vmatpush3.bf16.msra.mxu1 %v2813_v5  ;;  %2373 = vmatprep.mubr.msk.f32.mxu1 %vm2779_vm0, %v2780_v1 }
 0xdd5   :  { %2547 = vmatprep.subr.bf16.mxu1 %v2778_v0 }
 0xdd8   :  { %2549 = vmatpush3.bf16.msra.mxu1 %v2824_v10 }
 0xdd9   :  { %2558 = vmatprep.subr.bf16.mxu1 %v2778_v0 }
 0xdda   :  { %v999_v26 = vld [vmem:[#allocation2 + $0x20] sm:$0xff] }
 0xea6   :  { %v757_v61 = vpop.f32.mrb[6].mxu1 }
 0xea7   :  { %v761_v62 = vadd.f32 %v757_v61, %v164_v58  ;;  %v2353_v63 = vpop.f32.mrb[7].mxu1  ;;  %v174_v61 = vadd.f32 %v2891_v59, %v2841_v12 }
 0xea9   :  { %2663 = vtanh.f32 %v761_v62  ;;  %v2132_v5 = vmul.f32 -1.442695, %v761_v62 }
 0xeab   :  { %2665 = vpow2.f32 %v2132_v5  ;;  %v3002_v5 = vld [vmem:[#allocation3 + $0x70] ss:$0 sm:$0xff] }
 0xeb3   :  { %v2664_v2 = vpop.eup %2663 }
 0xeb4   :  { %771 = vrot.lane.b32.xlu0 %v2664_v2, %s2781_s26 }
 0xeb5   :  { %v2666_v3 = vpop.eup %2665 }
 0xeb6   :  { %v765_v4 = vadd.f32 1.0, %v2666_v3 }
 0xeb8   :  { %2667 = vrcp.f32 %v765_v4 }
 0xec2   :  { %v2668_v6 = vpop.eup %2667 }
 0xec3   :  { %v769_v8 = vmul.f32 %v2668_v6, %v677_v52  ;;  %v1010_v52 = vld [vmem:[#allocation3 + $0x68] sm:$0xff] }
 0xec4   :  { %v2979_v53 = vpack.c.bf16 %v1010_v52, %v1009_v51 }
 0xf26   :  { %v772_v7 = vpop.permute.xlu0 %771 }
 0xf27   :  { %v774_v10 = vmul.f32 %v2668_v6, %v772_v7 }
 0xf29   :  { %776 = vrot.lane.b32.xlu1 %v774_v10, %s2782_s27 }
 0xf9b   :  { %v777_v9 = vpop.permute.xlu1 %776 }
 0xf9c   :  { %v779_v57 = vadd.f32 %v777_v9, %v769_v8 }
 0xf9e   :  { %2669 = vtanh.f32 %v779_v57 }
 0xfa8   :  { %v2670_v15 = vpop.eup %2669 }
 0xfa9   :  { %782 = vrot.lane.b32.xlu0 %v2670_v15, %s2781_s26 }
0x101b   :  { %v783_v16 = vpop.permute.xlu0 %782 }
0x101c   :  { %v785_v17 = vmul.f32 %v2668_v6, %v783_v16 }
0x101e   :  { %787 = vrot.lane.b32.xlu1 %v785_v17, %s2782_s27 }
0x1090   :  { %v788_v21 = vpop.permute.xlu1 %787 }
0x1091   :  { %790 = vst.msk [vmem:[#allocation2 + $0x28] sm:$0xff] %vm177_vm3, %v788_v21  ;;  %2363 = vmatmul.mubr.msk.f32.vlgmr.msra.gmra.mrb[12].mxu0 %vm177_vm3, %v788_v21 }
0x1092   :  { %2553 = vmatpush3.bf16.msra.mxu0 %v2550_v14  ;;  %2384 = vmatprep.mubr.msk.f32.mxu0 %vm177_vm3, %v995_v22 }
0x1093   :  { %2555 = vmatprep.subr.bf16.mxu0 %v2554_v20 }
0x1096   :  { %2557 = vmatpush3.bf16.msra.mxu0 %v2554_v20 }
0x1097   :  { %2570 = vmatprep.subr.bf16.mxu0 %v2778_v0 }
0x1098   :  { %v1000_v27 = vld [vmem:[#allocation2 + $0x28] sm:$0xff] }
0x1099   :  { %2385 = vmatmul.mubr.msk.f32.vlgmr.msra.gmra.mrb[14].mxu0 %vm177_vm3, %v996_v23 }
0x109a   :  { %2387 = vmatprep.mubr.msk.f32.mxu0 %vm177_vm3, %v997_v24  ;;  %2572 = vmatpush3.bf16.msra.mxu0 %v2975_v50 }
0x109b   :  { %2573 = vmatprep.subr.bf16.mxu0 %v2778_v0 }
0x109d   :  { %2388 = vmatmul.mubr.msk.f32.gmra.mrb[16].mxu0 %vm177_vm3, %v998_v25 }
0x109e   :  { %2390 = vmatprep.mubr.msk.f32.mxu0 %vm177_vm3, %v999_v26  ;;  %2575 = vmatpush3.bf16.msra.mxu0 %v2979_v53 }
0x109f   :  { %2582 = vmatprep.subr.bf16.mxu0 %v2778_v0 }
0x10a1   :  { %2391 = vmatmul.mubr.msk.f32.gmra.mrb[18].mxu0 %vm177_vm3, %v1000_v27 }
0x1164   :  { %v859_v29 = vpop.f32.mrb[12].mxu0 }
0x1165   :  { %v863_v30 = vadd.f32 %v859_v29, %v169_v28  ;;  %v2364_v31 = vpop.f32.mrb[13].mxu0 }
0x1167   :  { %2671 = vtanh.f32 %v863_v30  ;;  %v2134_v39 = vmul.f32 -1.442695, %v863_v30 }
0x1169   :  { %2673 = vpow2.f32 %v2134_v39 }
0x116c   :  { %v2959_v32 = vpop.f32.mrb[14].mxu0 }
0x116d   :  { %v1106_v33 = vpop.f32.mrb[15].mxu0 }
0x116e   :  { %v1107_v3 = vadd.f32 %v3002_v5, %v1106_v33 }
0x1170   :  { %v2961_v34 = vpop.f32.mrb[16].mxu0 }
0x1171   :  { %v2672_v35 = vpop.eup %2671  ;;  %v2963_v36 = vpop.f32.mrb[17].mxu0 }
0x1172   :  { %873 = vrot.lane.b32.xlu0 %v2672_v35, %s2781_s26  ;;  %v1112_v35 = vadd.f32 %v2959_v32, %v3002_v5 }
0x1173   :  { %v2674_v60 = vpop.eup %2673 }
0x1174   :  { %v2966_v37 = vpop.f32.mrb[18].mxu0  ;;  %v867_v40 = vadd.f32 1.0, %v2674_v60 }
0x1175   :  { %v2968_v38 = vpop.f32.mrb[19].mxu0 }
0x1176   :  { %2675 = vrcp.f32 %v867_v40 }
0x1180   :  { %v2676_v41 = vpop.eup %2675 }
0x1181   :  { %v871_v44 = vmul.f32 %v2676_v41, %v779_v57 }
0x11e4   :  { %v874_v42 = vpop.permute.xlu0 %873 }
0x11e5   :  { %v876_v43 = vmul.f32 %v2676_v41, %v874_v42 }
0x11e7   :  { %878 = vrot.lane.b32.xlu1 %v876_v43, %s2782_s27 }
0x1259   :  { %v879_v45 = vpop.permute.xlu1 %878 }
0x125a   :  { %v2971_v46 = vadd.f32 %v879_v45, %v871_v44 }
0x125c   :  { %2677 = vtanh.f32 %v2971_v46 }
0x1266   :  { %v2678_v47 = vpop.eup %2677 }
0x1267   :  { %884 = vrot.lane.b32.xlu0 %v2678_v47, %s2781_s26 }
0x12d9   :  { %v885_v54 = vpop.permute.xlu0 %884 }
0x12da   :  { %v887_v55 = vmul.f32 %v2676_v41, %v885_v54 }
0x12dc   :  { %889 = vrot.lane.b32.xlu1 %v887_v55, %s2782_s27 }
0x134e   :  { %v890_v56 = vpop.permute.xlu1 %889 }
0x134f   :  { %892 = vst.msk [vmem:[#allocation2 + $0x30] sm:$0xff] %vm177_vm3, %v890_v56  ;;  %2374 = vmatmul.mubr.msk.f32.vlgmr.msra.gmra.mrb[8].mxu1 %vm177_vm3, %v890_v56 }
0x1350   :  { %2560 = vmatpush3.bf16.msra.mxu1 %v2975_v50  ;;  %2404 = vmatprep.mubr.msk.f32.mxu1 %vm2779_vm0, %v2780_v1 }
0x1351   :  { %2561 = vmatprep.subr.bf16.mxu1 %v2778_v0 }
0x1354   :  { %2563 = vmatpush3.bf16.msra.mxu1 %v2979_v53 }
0x1355   :  { %2564 = vmatprep.subr.bf16.mxu1 %v2778_v0 }
0x1356   :  { %v1001_v58 = vld [vmem:[#allocation2 + $0x30] sm:$0xff] }
0x1357   :  { %2405 = vmatmul.mubr.f32.vlgmr.msra.gmra.mrb[10].mxu1 %v2780_v1  ;;  %2393 = vmatprep.mubr.msk.f32.mxu0 %vm177_vm3, %v1001_v58 }
0x1358   :  { %2566 = vmatpush3.bf16.msra.mxu1 %v2975_v50  ;;  %2415 = vmatprep.mubr.msk.f32.mxu1 %vm2779_vm0, %v2780_v1 }
0x1359   :  { %2567 = vmatprep.subr.bf16.mxu1 %v2778_v0 }
0x135c   :  { %2569 = vmatpush3.bf16.msra.mxu1 %v2979_v53 }
0x135d   :  { %2576 = vmatprep.subr.bf16.mxu1 %v2778_v0 }
0x1422   :  { %v961_v62 = vpop.f32.mrb[8].mxu1 }
0x1423   :  { %v965_v63 = vadd.f32 %v961_v62, %v174_v61  ;;  %v2375_v2 = vpop.f32.mrb[9].mxu1 }
0x1425   :  { %v2136_v18 = vmul.f32 -1.442695, %v965_v63 }
0x142a   :  { %v1211_v4 = vpop.f32.mrb[10].mxu1 }
0x142b   :  { %v1215_v6 = vadd.f32 %v1211_v4, %v1107_v3  ;;  %v2406_v7 = vpop.f32.mrb[11].mxu1 }
0x142d   :  { %2679 = vtanh.f32 %v1215_v6  ;;  %v2146_v8 = vmul.f32 -1.442695, %v1215_v6 }
0x142f   :  { %2681 = vpow2.f32 %v2146_v8 }
0x1437   :  { %v2680_v10 = vpop.eup %2679 }
0x1438   :  { %1225 = vrot.lane.b32.xlu0 %v2680_v10, %s2781_s26 }
0x1439   :  { %v2682_v9 = vpop.eup %2681 }
0x143a   :  { %v1219_v57 = vadd.f32 1.0, %v2682_v9 }
0x143c   :  { %2683 = vrcp.f32 %v1219_v57 }
0x1446   :  { %v2684_v12 = vpop.eup %2683 }
0x1447   :  { %v1223_v13 = vmul.f32 0.0, %v2684_v12 }
0x14aa   :  { %v1226_v59 = vpop.permute.xlu0 %1225 }
0x14ab   :  { %v1228_v11 = vmul.f32 %v2684_v12, %v1226_v59 }
0x14ad   :  { %1230 = vrot.lane.b32.xlu1 %v1228_v11, %s2782_s27 }
0x151f   :  { %v1231_v14 = vpop.permute.xlu1 %1230 }
0x1520   :  { %v1233_v15 = vadd.f32 %v1231_v14, %v1223_v13 }
0x1522   :  { %2685 = vtanh.f32 %v1233_v15 }
0x1523   :  { %2687 = vtanh.f32 %v965_v63  ;;  %v1117_v63 = vadd.f32 %v3002_v5, %v2963_v36 }
0x1524   :  { %2689 = vpow2.f32 %v2136_v18 }
0x152c   :  { %v2686_v16 = vpop.eup %2685 }
0x152d   :  { %1236 = vrot.lane.b32.xlu0 %v2686_v16, %s2781_s26  ;;  %v2688_v17 = vpop.eup %2687 }
0x152e   :  { %v2690_v19 = vpop.eup %2689 }
0x152f   :  { %v969_v20 = vadd.f32 1.0, %v2690_v19 }
0x1531   :  { %975 = vrot.lane.b32.xlu0 %v2688_v17, %s2781_s26  ;;  %2691 = vrcp.f32 %v969_v20  ;;  %v1122_v17 = vadd.f32 %v2961_v34, %v3002_v5 }
0x153b   :  { %v2692_v23 = vpop.eup %2691 }
0x153c   :  { %v973_v27 = vmul.f32 %v2692_v23, %v2971_v46 }
0x159f   :  { %v1237_v21 = vpop.permute.xlu0 %1236 }
0x15a0   :  { %v1239_v22 = vmul.f32 %v2684_v12, %v1237_v21 }
0x15a2   :  { %1241 = vrot.lane.b32.xlu1 %v1239_v22, %s2782_s27 }
0x15a3   :  { %v976_v24 = vpop.permute.xlu0 %975 }
0x15a4   :  { %v978_v25 = vmul.f32 %v2692_v23, %v976_v24 }
0x15a6   :  { %980 = vrot.lane.b32.xlu0 %v978_v25, %s2782_s27 }
0x1614   :  { %v1242_v26 = vpop.permute.xlu1 %1241 }
0x1615   :  { %2416 = vmatmul.mubr.msk.f32.vlgmr.msra.gmra.mrb[12].mxu1 %vm177_vm3, %v1242_v26 }
0x1616   :  { %2578 = vmatpush3.bf16.msra.mxu1 %v2975_v50  ;;  %2437 = vmatprep.mubr.msk.f32.mxu1 %vm2779_vm0, %v2780_v1 }
0x1617   :  { %2579 = vmatprep.subr.bf16.mxu1 %v2778_v0 }
0x1618   :  { %v981_v28 = vpop.permute.xlu0 %980 }
0x1619   :  { %v983_v29 = vadd.f32 %v981_v28, %v973_v27 }
0x161a   :  { %2581 = vmatpush3.bf16.msra.mxu1 %v2979_v53 }
0x161b   :  { %2693 = vtanh.f32 %v983_v29  ;;  %2588 = vmatprep.subr.bf16.mxu1 %v2778_v0 }
0x1625   :  { %v2694_v30 = vpop.eup %2693 }
0x1626   :  { %986 = vrot.lane.b32.xlu0 %v2694_v30, %s2781_s26 }
0x1698   :  { %v987_v31 = vpop.permute.xlu0 %986 }
0x1699   :  { %v989_v33 = vmul.f32 %v2692_v23, %v987_v31 }
0x169b   :  { %991 = vrot.lane.b32.xlu0 %v989_v33, %s2782_s27 }
0x16e8   :  { %v1311_v39 = vpop.f32.mrb[12].mxu1 }
0x16e9   :  { %v1315_v60 = vadd.f32 %v1311_v39, %v1112_v35  ;;  %v2417_v40 = vpop.f32.mrb[13].mxu1  ;;  %v1127_v39 = vadd.f32 %v3002_v5, %v2968_v38 }
0x16eb   :  { %2695 = vtanh.f32 %v1315_v60  ;;  %v2148_v44 = vmul.f32 -1.442695, %v1315_v60 }
0x16ed   :  { %2697 = vpow2.f32 %v2148_v44 }
0x16f5   :  { %v2696_v41 = vpop.eup %2695 }
0x16f6   :  { %1325 = vrot.lane.b32.xlu1 %v2696_v41, %s2781_s26 }
0x16f7   :  { %v2698_v45 = vpop.eup %2697 }
0x16f8   :  { %v1319_v32 = vadd.f32 1.0, %v2698_v45 }
0x16fa   :  { %2699 = vrcp.f32 %v1319_v32 }
0x1704   :  { %v2700_v46 = vpop.eup %2699 }
0x1705   :  { %v1323_v49 = vmul.f32 %v2700_v46, %v1233_v15 }
0x170d   :  { %v992_v42 = vpop.permute.xlu0 %991 }
0x170e   :  { %994 = vst.msk [vmem:[#allocation2 + $0x38] sm:$0xff] %vm177_vm3, %v992_v42 }
0x1715   :  { %v1002_v43 = vld [vmem:[#allocation2 + $0x38] sm:$0xff] }
0x1716   :  { %2394 = vmatmul.mubr.msk.f32.gmra.mrb[20].mxu0 %vm177_vm3, %v1002_v43 }
0x1717   :  { %2426 = vmatprep.mubr.msk.f32.mxu0 %vm2779_vm0, %v2780_v1 }
0x1768   :  { %v1326_v47 = vpop.permute.xlu1 %1325 }
0x1769   :  { %v1328_v48 = vmul.f32 %v2700_v46, %v1326_v47 }
0x176b   :  { %1330 = vrot.lane.b32.xlu1 %v1328_v48, %s2782_s27 }
0x17dd   :  { %v1331_v51 = vpop.permute.xlu1 %1330 }
0x17de   :  { %v1333_v52 = vadd.f32 %v1331_v51, %v1323_v49 }
0x17e0   :  { %2701 = vtanh.f32 %v1333_v52 }
0x17e9   :  { %v3029_v54 = vpop.f32.mrb[20].mxu0 }
0x17ea   :  { %v2702_v55 = vpop.eup %2701  ;;  %v3031_v56 = vpop.f32.mrb[21].mxu0 }
0x17eb   :  { %1336 = vrot.lane.b32.xlu1 %v2702_v55, %s2781_s26 }
0x185d   :  { %v1337_v58 = vpop.permute.xlu1 %1336 }
0x185e   :  { %v1339_v61 = vmul.f32 %v2700_v46, %v1337_v58 }
0x1860   :  { %1341 = vrot.lane.b32.xlu1 %v1339_v61, %s2782_s27  ;;  %v1132_v61 = vadd.f32 %v2966_v37, %v3002_v5 }
0x18d2   :  { %v1342_v62 = vpop.permute.xlu1 %1341 }
0x18d3   :  { %2427 = vmatmul.mubr.msk.f32.vlgmr.msra.gmra.mrb[22].mxu0 %vm177_vm3, %v1342_v62 }
0x18d4   :  { %2584 = vmatpush3.bf16.msra.mxu0 %v2975_v50  ;;  %2448 = vmatprep.mubr.msk.f32.mxu0 %vm2779_vm0, %v2780_v1 }
0x18d5   :  { %2585 = vmatprep.subr.bf16.mxu0 %v2778_v0 }
0x18d8   :  { %2587 = vmatpush3.bf16.msra.mxu0 %v2979_v53 }
0x18d9   :  { %2594 = vmatprep.subr.bf16.mxu0 %v2778_v0 }
0x19a6   :  { %v1411_v2 = vpop.f32.mrb[22].mxu0 }
0x19a7   :  { %v1415_v3 = vadd.f32 %v1411_v2, %v1117_v63  ;;  %v2428_v4 = vpop.f32.mrb[23].mxu0 }
0x19a9   :  { %2703 = vtanh.f32 %v1415_v3  ;;  %v2150_v7 = vmul.f32 -1.442695, %v1415_v3 }
0x19ab   :  { %2705 = vpow2.f32 %v2150_v7 }
0x19b3   :  { %v2704_v6 = vpop.eup %2703 }
0x19b4   :  { %1425 = vrot.lane.b32.xlu0 %v2704_v6, %s2781_s26 }
0x19b5   :  { %v2706_v10 = vpop.eup %2705 }
0x19b6   :  { %v1419_v8 = vadd.f32 1.0, %v2706_v10 }
0x19b8   :  { %2707 = vrcp.f32 %v1419_v8 }
0x19c2   :  { %v2708_v9 = vpop.eup %2707 }
0x19c3   :  { %v1423_v59 = vmul.f32 %v2708_v9, %v1333_v52 }
0x1a26   :  { %v1426_v57 = vpop.permute.xlu0 %1425 }
0x1a27   :  { %v1428_v12 = vmul.f32 %v2708_v9, %v1426_v57 }
0x1a29   :  { %1430 = vrot.lane.b32.xlu1 %v1428_v12, %s2782_s27 }
0x1a9b   :  { %v1431_v11 = vpop.permute.xlu1 %1430 }
0x1a9c   :  { %v1433_v36 = vadd.f32 %v1431_v11, %v1423_v59 }
0x1a9e   :  { %2709 = vtanh.f32 %v1433_v36 }
0x1aa8   :  { %v2710_v13 = vpop.eup %2709 }
0x1aa9   :  { %1436 = vrot.lane.b32.xlu0 %v2710_v13, %s2781_s26 }
0x1b1b   :  { %v1437_v14 = vpop.permute.xlu0 %1436 }
0x1b1c   :  { %v1439_v15 = vmul.f32 %v2708_v9, %v1437_v14 }
0x1b1e   :  { %1441 = vrot.lane.b32.xlu1 %v1439_v15, %s2782_s27 }
0x1b90   :  { %v1442_v16 = vpop.permute.xlu1 %1441 }
0x1b91   :  { %2438 = vmatmul.mubr.msk.f32.vlgmr.msra.gmra.mrb[14].mxu1 %vm177_vm3, %v1442_v16 }
0x1b92   :  { %2590 = vmatpush3.bf16.msra.mxu1 %v2975_v50  ;;  %2459 = vmatprep.mubr.msk.f32.mxu1 %vm2779_vm0, %v2780_v1 }
0x1b93   :  { %2591 = vmatprep.subr.bf16.mxu1 %v2778_v0 }
0x1b96   :  { %2593 = vmatpush3.bf16.msra.mxu1 %v2979_v53 }
0x1b97   :  { %2600 = vmatprep.subr.bf16.mxu1 %v2778_v0 }
0x1c64   :  { %v1511_v18 = vpop.f32.mrb[14].mxu1 }
0x1c65   :  { %v1515_v19 = vadd.f32 %v1511_v18, %v1122_v17  ;;  %v2439_v20 = vpop.f32.mrb[15].mxu1 }
0x1c67   :  { %2711 = vtanh.f32 %v1515_v19  ;;  %v2152_v22 = vmul.f32 -1.442695, %v1515_v19 }
0x1c69   :  { %2713 = vpow2.f32 %v2152_v22 }
0x1c71   :  { %v2712_v21 = vpop.eup %2711 }
0x1c72   :  { %1525 = vrot.lane.b32.xlu0 %v2712_v21, %s2781_s26 }
0x1c73   :  { %v2714_v23 = vpop.eup %2713 }
0x1c74   :  { %v1519_v24 = vadd.f32 1.0, %v2714_v23 }
0x1c76   :  { %2715 = vrcp.f32 %v1519_v24 }
0x1c80   :  { %v2716_v25 = vpop.eup %2715 }
0x1c81   :  { %v1523_v28 = vmul.f32 %v2716_v25, %v1433_v36  ;;  %v1137_v36 = vadd.f32 %v3002_v5, %v3031_v56 }
0x1ce4   :  { %v1526_v26 = vpop.permute.xlu0 %1525 }
0x1ce5   :  { %v1528_v27 = vmul.f32 %v2716_v25, %v1526_v26 }
0x1ce7   :  { %1530 = vrot.lane.b32.xlu1 %v1528_v27, %s2782_s27 }
0x1d59   :  { %v1531_v29 = vpop.permute.xlu1 %1530 }
0x1d5a   :  { %v1533_v34 = vadd.f32 %v1531_v29, %v1523_v28  ;;  %v1142_v29 = vadd.f32 %v3029_v54, %v3002_v5  ;;  %v1940_v54 = vld [vmem:[#allocation3 + $0x78] sm:$0xff] }
0x1d5c   :  { %2717 = vtanh.f32 %v1533_v34 }
0x1d66   :  { %v2718_v30 = vpop.eup %2717 }
0x1d67   :  { %1536 = vrot.lane.b32.xlu0 %v2718_v30, %s2781_s26 }
0x1dd9   :  { %v1537_v31 = vpop.permute.xlu0 %1536 }
0x1dda   :  { %v1539_v33 = vmul.f32 %v2716_v25, %v1537_v31 }
0x1ddc   :  { %1541 = vrot.lane.b32.xlu1 %v1539_v33, %s2782_s27 }
0x1e4e   :  { %v1542_v35 = vpop.permute.xlu1 %1541 }
0x1e4f   :  { %2449 = vmatmul.mubr.msk.f32.vlgmr.msra.gmra.mrb[24].mxu0 %vm177_vm3, %v1542_v35 }
0x1e50   :  { %2596 = vmatpush3.bf16.msra.mxu0 %v2975_v50  ;;  %2470 = vmatprep.mubr.msk.f32.mxu0 %vm2779_vm0, %v2780_v1 }
0x1e51   :  { %2597 = vmatprep.subr.bf16.mxu0 %v2778_v0 }
0x1e54   :  { %2599 = vmatpush3.bf16.msra.mxu0 %v2979_v53 }
0x1e55   :  { %2606 = vmatprep.subr.bf16.mxu0 %v2778_v0 }
0x1f22   :  { %v1611_v60 = vpop.f32.mrb[24].mxu0 }
0x1f23   :  { %v1615_v40 = vadd.f32 %v1611_v60, %v1127_v39  ;;  %v2450_v41 = vpop.f32.mrb[25].mxu0 }
0x1f25   :  { %2719 = vtanh.f32 %v1615_v40  ;;  %v2154_v43 = vmul.f32 -1.442695, %v1615_v40 }
0x1f27   :  { %2721 = vpow2.f32 %v2154_v43 }
0x1f2f   :  { %v2720_v42 = vpop.eup %2719 }
0x1f30   :  { %1625 = vrot.lane.b32.xlu0 %v2720_v42, %s2781_s26 }
0x1f31   :  { %v2722_v44 = vpop.eup %2721 }
0x1f32   :  { %v1619_v45 = vadd.f32 1.0, %v2722_v44  ;;  %v1941_v44 = vld [vmem:[#allocation3 + $0x80] sm:$0xff] }
0x1f34   :  { %2723 = vrcp.f32 %v1619_v45  ;;  %v1942_v45 = vld [vmem:[#allocation3 + $0x88] sm:$0xff] }
0x1f3e   :  { %v2724_v32 = vpop.eup %2723 }
0x1f3f   :  { %v1623_v48 = vmul.f32 %v2724_v32, %v1533_v34 }
0x1fa2   :  { %v1626_v46 = vpop.permute.xlu0 %1625 }
0x1fa3   :  { %v1628_v47 = vmul.f32 %v2724_v32, %v1626_v46  ;;  %v1943_v46 = vld [vmem:[#allocation3 + $0x90] sm:$0xff] }
0x1fa5   :  { %1630 = vrot.lane.b32.xlu1 %v1628_v47, %s2782_s27  ;;  %v2610_v47 = vpack.c.bf16 %v1943_v46, %v1942_v45 }
0x2017   :  { %v1631_v49 = vpop.permute.xlu1 %1630 }
0x2018   :  { %v1633_v38 = vadd.f32 %v1631_v49, %v1623_v48 }
0x201a   :  { %2725 = vtanh.f32 %v1633_v38 }
0x2024   :  { %v2726_v51 = vpop.eup %2725 }
0x2025   :  { %1636 = vrot.lane.b32.xlu0 %v2726_v51, %s2781_s26 }
0x2097   :  { %v1637_v52 = vpop.permute.xlu0 %1636 }
0x2098   :  { %v1639_v55 = vmul.f32 %v2724_v32, %v1637_v52  ;;  %v2607_v32 = vpack.c.bf16 %v1941_v44, %v1940_v54  ;;  %v2025_v52 = vld [vmem:[#allocation3 + $0xa0] sm:$0xff] }
0x209a   :  { %1641 = vrot.lane.b32.xlu1 %v1639_v55, %s2782_s27  ;;  %v2026_v55 = vld [vmem:[#allocation3 + $0xa8] sm:$0xff] }
0x210c   :  { %v1642_v58 = vpop.permute.xlu1 %1641 }
0x210d   :  { %2460 = vmatmul.mubr.msk.f32.vlgmr.msra.gmra.mrb[16].mxu1 %vm177_vm3, %v1642_v58  ;;  %v2613_v58 = vpack.c.bf16 %v2026_v55, %v2025_v52 }
0x210e   :  { %2602 = vmatpush3.bf16.msra.mxu1 %v2975_v50  ;;  %2481 = vmatprep.mubr.msk.f32.mxu1 %vm2779_vm0, %v2780_v1 }
0x210f   :  { %2603 = vmatprep.subr.bf16.mxu1 %v2778_v0 }
0x2112   :  { %2605 = vmatpush3.bf16.msra.mxu1 %v2979_v53 }
0x2113   :  { %2612 = vmatprep.subr.bf16.mxu1 %v2778_v0 }
0x21e0   :  { %v1711_v62 = vpop.f32.mrb[16].mxu1 }
0x21e1   :  { %v1715_v63 = vadd.f32 %v1711_v62, %v1132_v61  ;;  %v2461_v2 = vpop.f32.mrb[17].mxu1  ;;  %v2161_v61 = vld [vmem:[#allocation3 + $0x98] ss:$0 sm:$0xff] }
0x21e3   :  { %2727 = vtanh.f32 %v1715_v63  ;;  %v2156_v50 = vmul.f32 -1.442695, %v1715_v63 }
0x21e5   :  { %2729 = vpow2.f32 %v2156_v50 }
0x21ed   :  { %v2728_v3 = vpop.eup %2727 }
0x21ee   :  { %1725 = vrot.lane.b32.xlu0 %v2728_v3, %s2781_s26  ;;  %v2163_v3 = vld [vmem:[#allocation3 + $0xb0] ss:$0 sm:$0xff] }
0x21ef   :  { %v2730_v4 = vpop.eup %2729 }
0x21f0   :  { %v1719_v6 = vadd.f32 1.0, %v2730_v4 }
0x21f2   :  { %2731 = vrcp.f32 %v1719_v6 }
0x21fc   :  { %v2732_v7 = vpop.eup %2731 }
0x21fd   :  { %v1723_v8 = vmul.f32 %v2732_v7, %v1633_v38 }
0x2260   :  { %v1726_v10 = vpop.permute.xlu0 %1725 }
0x2261   :  { %v1728_v53 = vmul.f32 %v2732_v7, %v1726_v10 }
0x2263   :  { %1730 = vrot.lane.b32.xlu1 %v1728_v53, %s2782_s27 }
0x22d5   :  { %v1731_v9 = vpop.permute.xlu1 %1730 }
0x22d6   :  { %v1733_v37 = vadd.f32 %v1731_v9, %v1723_v8 }
0x22d8   :  { %2733 = vtanh.f32 %v1733_v37 }
0x22e2   :  { %v2734_v57 = vpop.eup %2733 }
0x22e3   :  { %1736 = vrot.lane.b32.xlu0 %v2734_v57, %s2781_s26 }
0x2355   :  { %v1737_v12 = vpop.permute.xlu0 %1736 }
0x2356   :  { %v1739_v59 = vmul.f32 %v2732_v7, %v1737_v12 }
0x2358   :  { %1741 = vrot.lane.b32.xlu1 %v1739_v59, %s2782_s27 }
0x23ca   :  { %v1742_v11 = vpop.permute.xlu1 %1741 }
0x23cb   :  { %2471 = vmatmul.mubr.msk.f32.vlgmr.msra.gmra.mrb[26].mxu0 %vm177_vm3, %v1742_v11 }
0x23cc   :  { %2492 = vmatprep.mubr.msk.f32.mxu0 %vm2779_vm0, %v2780_v1  ;;  %2608 = vmatpush3.bf16.msra.mxu0 %v2607_v32 }
0x23cd   :  { %2609 = vmatprep.subr.bf16.mxu0 %v2778_v0 }
0x23d0   :  { %2611 = vmatpush3.bf16.msra.mxu0 %v2610_v47 }
0x249e   :  { %v1811_v13 = vpop.f32.mrb[26].mxu0 }
0x249f   :  { %v1815_v14 = vadd.f32 %v1811_v13, %v1137_v36  ;;  %v2472_v15 = vpop.f32.mrb[27].mxu0 }
0x24a1   :  { %2735 = vtanh.f32 %v1815_v14  ;;  %v2158_v17 = vmul.f32 -1.442695, %v1815_v14 }
0x24a3   :  { %2737 = vpow2.f32 %v2158_v17 }
0x24ab   :  { %v2736_v16 = vpop.eup %2735 }
0x24ac   :  { %1825 = vrot.lane.b32.xlu0 %v2736_v16, %s2781_s26 }
0x24ad   :  { %v2738_v18 = vpop.eup %2737 }
0x24ae   :  { %v1819_v19 = vadd.f32 1.0, %v2738_v18 }
0x24b0   :  { %2739 = vrcp.f32 %v1819_v19 }
0x24ba   :  { %v2740_v20 = vpop.eup %2739 }
0x24bb   :  { %v1823_v23 = vmul.f32 %v2740_v20, %v1733_v37 }
0x251e   :  { %v1826_v21 = vpop.permute.xlu0 %1825 }
0x251f   :  { %v1828_v22 = vmul.f32 %v2740_v20, %v1826_v21 }
0x2521   :  { %1830 = vrot.lane.b32.xlu1 %v1828_v22, %s2782_s27 }
0x2593   :  { %v1831_v24 = vpop.permute.xlu1 %1830 }
0x2594   :  { %v1833_v56 = vadd.f32 %v1831_v24, %v1823_v23 }
0x2596   :  { %2741 = vtanh.f32 %v1833_v56 }
0x25a0   :  { %v2742_v25 = vpop.eup %2741 }
0x25a1   :  { %1836 = vrot.lane.b32.xlu0 %v2742_v25, %s2781_s26 }
0x2613   :  { %v1837_v26 = vpop.permute.xlu0 %1836 }
0x2614   :  { %v1839_v27 = vmul.f32 %v2740_v20, %v1837_v26 }
0x2616   :  { %1841 = vrot.lane.b32.xlu1 %v1839_v27, %s2782_s27 }
0x2688   :  { %v1842_v28 = vpop.permute.xlu1 %1841 }
0x2689   :  { %2482 = vmatmul.mubr.msk.f32.vlgmr.msra.gmra.mrb[18].mxu1 %vm177_vm3, %v1842_v28 }
0x268a   :  { %2499 = vmatprep.mubr.msk.f32.mxu1 %vm2779_vm0, %v2780_v1  ;;  %2614 = vmatpush3.bf16.msra.mxu1 %v2613_v58 }
0x275c   :  { %v1911_v34 = vpop.f32.mrb[18].mxu1 }
0x275d   :  { %v1915_v30 = vadd.f32 %v1911_v34, %v1142_v29  ;;  %v2483_v31 = vpop.f32.mrb[19].mxu1 }
0x275f   :  { %2743 = vtanh.f32 %v1915_v30  ;;  %v2160_v35 = vmul.f32 -1.442695, %v1915_v30 }
0x2761   :  { %2745 = vpow2.f32 %v2160_v35 }
0x2769   :  { %v2744_v33 = vpop.eup %2743 }
0x276a   :  { %1925 = vrot.lane.b32.xlu0 %v2744_v33, %s2781_s26 }
0x276b   :  { %v2746_v39 = vpop.eup %2745 }
0x276c   :  { %v1919_v60 = vadd.f32 1.0, %v2746_v39 }
0x276e   :  { %2747 = vrcp.f32 %v1919_v60 }
0x2778   :  { %v2748_v40 = vpop.eup %2747 }
0x2779   :  { %v1923_v1 = vmul.f32 %v2748_v40, %v1833_v56 }
0x27dc   :  { %v1926_v41 = vpop.permute.xlu0 %1925 }
0x27dd   :  { %v1928_v42 = vmul.f32 %v2748_v40, %v1926_v41 }
0x27df   :  { %1930 = vrot.lane.b32.xlu1 %v1928_v42, %s2782_s27 }
0x2851   :  { %v1931_v43 = vpop.permute.xlu1 %1930 }
0x2852   :  { %v1933_v5 = vadd.f32 %v1931_v43, %v1923_v1 }
0x2854   :  { %2749 = vtanh.f32 %v1933_v5 }
0x285e   :  { %v2750_v48 = vpop.eup %2749 }
0x285f   :  { %1936 = vrot.lane.b32.xlu0 %v2750_v48, %s2781_s26 }
0x28d1   :  { %v1937_v49 = vpop.permute.xlu0 %1936 }
0x28d2   :  { %v1939_v38 = vmul.f32 %v2748_v40, %v1937_v49 }
0x28d4   :  { %1950 = vrot.lane.b32.xlu1 %v1939_v38, %s2782_s27 }
0x2946   :  { %v1951_v51 = vpop.permute.xlu1 %1950 }
0x2947   :  { %2493 = vmatmul.mubr.msk.f32.vlgmr.msra.gmra.mrb[28].mxu0 %vm177_vm3, %v1951_v51 }
0x2a1a   :  { %v2020_v62 = vpop.f32.mrb[28].mxu0 }
0x2a1b   :  { %v2021_v63 = vadd.f32 %v2161_v61, %v2020_v62  ;;  %v2494_v2 = vpop.f32.mrb[29].mxu0 }
0x2a1d   :  { %v2024_v0 = vmax.f32 %v2021_v63, 0.0 }
0x2a1f   :  { %2500 = vmatmul.mubr.msk.f32.vlgmr.msra.gmra.mrb[20].mxu1 %vm2032_vm4, %v2024_v0 }
0x2af2   :  { %v2102_v50 = vpop.f32.mrb[20].mxu1 }
0x2af3   :  { %v2103_v4 = vadd.f32 %v2163_v3, %v2102_v50  ;;  %v2501_v6 = vpop.f32.mrb[21].mxu1 }
0x2af5   :  { %2106 = vst [vmem:[%s3112_s2] sm:$0xff] %v2103_v4 }
0x2af6   :  { %2111 = vsyncpa [#allocation4], 1 }

</bundles_post_ra>
